<compile_context>
chip_gen: v6e
topology: v6e:2x2x1
jax: 0.10.0
libtpu: 0.0.40
codegen_flags: <defaults>
</compile_context>

<pallas_src>
import functools
import math

import jax
import jax.numpy as jnp
from jax import lax
from jax.experimental import pallas as pl
from jax.experimental.pallas import tpu as pltpu
from jax.scipy.special import erf as _erf_exact

LN_EPS = 1e-12


def _round_up(x, m):
    return ((x + m - 1) // m) * m


def _infer_vmem_limit():
    # Generation-aware scoped-VMEM budget: ~78% of physical capacity
    # (~100 MiB on v5e/v6e's 128 MiB, ~50 MiB on v7x's 64 MiB per TC).
    try:
        cap = pltpu.get_tpu_info().vmem_capacity_bytes
        return min(int(0.78 * cap), 112 * 1024 * 1024)
    except Exception:
        return 48 * 1024 * 1024   # safe on all generations


_VMEM_LIMIT = _infer_vmem_limit()


# ----------------------------------------------------------------------------
# In-kernel math helpers
# ----------------------------------------------------------------------------
def _erf_f32(x):
    # Abramowitz & Stegun 7.1.26 (|err| <= 1.5e-7): matches exact-erf GELU to
    # far below fp32 tolerance without relying on an erf primitive in Mosaic.
    a = jnp.abs(x)
    t = 1.0 / (1.0 + 0.3275911 * a)
    poly = ((((1.061405429 * t - 1.453152027) * t + 1.421413741) * t
             - 0.284496736) * t + 0.254829592) * t
    y = 1.0 - poly * jnp.exp(-a * a)
    return jnp.where(x < 0, -y, y)


def _gelu_f32(x):
    return x * 0.5 * (1.0 + _erf_f32(x * (1.0 / math.sqrt(2.0))))


def _layernorm_f32(y, gamma_f32, beta_f32):
    # Centered two-pass variance: robust against f32 cancellation.
    mean = jnp.mean(y, axis=-1, keepdims=True)
    yc = y - mean
    var = jnp.mean(yc * yc, axis=-1, keepdims=True)
    return yc * lax.rsqrt(var + LN_EPS) * gamma_f32 + beta_f32


# ----------------------------------------------------------------------------
# Kernel A: fused QKV projection + multi-head attention + output dense + LN
#           (one batch per grid step)
# ----------------------------------------------------------------------------
def _attn_block_kernel(x_ref, mask_ref, wqkv_ref, bqkv_ref, wao_ref, bao_ref,
                       g_ref, beta_ref, o_ref, *, num_heads, scale):
    x = x_ref[0]                                  # (S, H), native dtype
    dtype = x.dtype
    hsz = x.shape[-1]
    d = hsz // num_heads
    mask = mask_ref[0, 0].astype(jnp.float32)     # (1, S) additive mask

    # Fused QKV projection: one (S, H) x (H, 3H) MXU matmul, f32 accumulation.
    qkv = jnp.dot(x, wqkv_ref[...], preferred_element_type=jnp.float32)
    qkv = (qkv + bqkv_ref[...].astype(jnp.float32)).astype(dtype)

    # Per-head attention, all in VMEM/vregs (no HBM round trip, no transposes).
    ctx_heads = []
    for h in range(num_heads):
        q = qkv[:, h * d:(h + 1) * d]
        k = qkv[:, hsz + h * d:hsz + (h + 1) * d]
        v = qkv[:, 2 * hsz + h * d:2 * hsz + (h + 1) * d]
        s = lax.dot_general(q, k, dimension_numbers=(((1,), (1,)), ((), ())),
                            preferred_element_type=jnp.float32)
        s = s * scale + mask
        s = s - jnp.max(s, axis=-1, keepdims=True)
        p = jnp.exp(s)
        denom = jnp.sum(p, axis=-1, keepdims=True)          # (S, 1)
        # TODO(synk): attention-probability dropout omitted (eval -> identity).
        ctx_h = jnp.dot(p.astype(dtype), v, preferred_element_type=jnp.float32)
        # Fold softmax normalization after P@V: one (S,1) reciprocal + an
        # (S,d) multiply instead of an (S,S) divide.
        ctx_h = ctx_h * pl.reciprocal(denom, approx=False)
        ctx_heads.append(ctx_h)
    ctx = jnp.concatenate(ctx_heads, axis=-1)                # (S, H), f32

    # Attention output dense + residual + LayerNorm (fused epilogue).
    y = jnp.dot(ctx.astype(dtype), wao_ref[...],
                preferred_element_type=jnp.float32)
    y = y + bao_ref[...].astype(jnp.float32) + x.astype(jnp.float32)
    # TODO(synk): hidden dropout before the residual add omitted (eval mode).
    out = _layernorm_f32(y, g_ref[...].astype(jnp.float32),
                         beta_ref[...].astype(jnp.float32))
    o_ref[0] = out.astype(o_ref.dtype)


# ----------------------------------------------------------------------------
# Kernel B: fused GELU intermediate dense + output dense + residual + LN
#           (token-row tiles; the (bm, 4H) intermediate stays in VMEM)
# ----------------------------------------------------------------------------
def _mlp_block_kernel(x_ref, wi_ref, bi_ref, wo_ref, bo_ref, g_ref, beta_ref,
                      o_ref):
    x = x_ref[...]                                # (bm, H), native dtype
    dtype = x.dtype
    h1 = jnp.dot(x, wi_ref[...], preferred_element_type=jnp.float32)
    h1 = _gelu_f32(h1 + bi_ref[...].astype(jnp.float32))     # (bm, 4H) f32
    h2 = jnp.dot(h1.astype(dtype), wo_ref[...],
                 preferred_element_type=jnp.float32)
    y = h2 + bo_ref[...].astype(jnp.float32) + x.astype(jnp.float32)
    # TODO(synk): hidden dropout before the residual add omitted (eval mode).
    out = _layernorm_f32(y, g_ref[...].astype(jnp.float32),
                         beta_ref[...].astype(jnp.float32))
    o_ref[...] = out.astype(o_ref.dtype)


# ----------------------------------------------------------------------------
# pallas_call wrappers
# ----------------------------------------------------------------------------
def _compiler_params(n_grid_dims):
    return pltpu.CompilerParams(
        dimension_semantics=("parallel",) * n_grid_dims,
        vmem_limit_bytes=_VMEM_LIMIT)


def _attention_block(h, mask, p, *, num_heads):
    """h: (B, S, H); mask: (B, 1, 1, S) additive. Returns LN(attn_out) (B,S,H)."""
    B, S, H = h.shape
    scale = 1.0 / math.sqrt(H // num_heads)
    # NOTE(v7x): grid=(B,) only keeps both TensorCores busy when B >= 2.
    return pl.pallas_call(
        functools.partial(_attn_block_kernel, num_heads=num_heads, scale=scale),
        out_shape=jax.ShapeDtypeStruct((B, S, H), h.dtype),
        grid_spec=pltpu.PrefetchScalarGridSpec(
            num_scalar_prefetch=0,
            grid=(B,),
            in_specs=[
                pl.BlockSpec((1, S, H), lambda b: (b, 0, 0)),      # hidden
                pl.BlockSpec((1, 1, 1, S), lambda b: (b, 0, 0, 0)),  # mask
                pl.BlockSpec((H, 3 * H), lambda b: (0, 0)),        # Wqkv (resident)
                pl.BlockSpec((1, 3 * H), lambda b: (0, 0)),        # bqkv
                pl.BlockSpec((H, H), lambda b: (0, 0)),            # Wao (resident)
                pl.BlockSpec((1, H), lambda b: (0, 0)),            # bao
                pl.BlockSpec((1, H), lambda b: (0, 0)),            # LN gamma
                pl.BlockSpec((1, H), lambda b: (0, 0)),            # LN beta
            ],
            out_specs=pl.BlockSpec((1, S, H), lambda b: (b, 0, 0)),
        ),
        compiler_params=_compiler_params(1),
    )(h, mask, p["wqkv"], p["bqkv"], p["wao"], p["bao"],
      p["ao_g"], p["ao_beta"])


def _pick_block_m(M, H, I, itemsize):
    """Largest token-row tile whose double-buffered x/out tiles + f32
    intermediate fit next to the (double-buffered) resident MLP weights."""
    budget = int(0.70 * _VMEM_LIMIT) - 2 * 2 * H * I * itemsize
    budget = max(budget, 2 * 1024 * 1024)
    m8 = max(_round_up(M, 8), 8)
    fitting = []
    for bm in (512, 256, 128, 64, 32, 16, 8):
        if bm > m8:
            continue
        per_step = 2 * 2 * bm * H * itemsize + bm * I * 4
        if per_step <= budget:
            fitting.append(bm)
    if not fitting:
        return 8
    for bm in fitting:            # prefer no padding
        if m8 % bm == 0:
            return bm
    return fitting[0]


def _mlp_block(x2d, p):
    """LayerNorm(gelu(x @ Wi + bi) @ Wo + bo + x). Weights in (K, N) layout."""
    M, H = x2d.shape
    I = p["wi"].shape[1]
    bm = _pick_block_m(M, H, I, x2d.dtype.itemsize)
    Mp = _round_up(M, bm)
    xin = x2d if Mp == M else jnp.pad(x2d, ((0, Mp - M), (0, 0)))
    out = pl.pallas_call(
        _mlp_block_kernel,
        out_shape=jax.ShapeDtypeStruct((Mp, H), x2d.dtype),
        grid_spec=pltpu.PrefetchScalarGridSpec(
            num_scalar_prefetch=0,
            grid=(Mp // bm,),
            in_specs=[
                pl.BlockSpec((bm, H), lambda i: (i, 0)),   # token tile
                pl.BlockSpec((H, I), lambda i: (0, 0)),    # Wi (resident)
                pl.BlockSpec((1, I), lambda i: (0, 0)),    # bi
                pl.BlockSpec((I, H), lambda i: (0, 0)),    # Wo (resident)
                pl.BlockSpec((1, H), lambda i: (0, 0)),    # bo
                pl.BlockSpec((1, H), lambda i: (0, 0)),    # LN gamma
                pl.BlockSpec((1, H), lambda i: (0, 0)),    # LN beta
            ],
            out_specs=pl.BlockSpec((bm, H), lambda i: (i, 0)),
        ),
        compiler_params=_compiler_params(1),
    )(xin, p["wi"], p["bi"], p["wo"], p["bo"], p["o_g"], p["o_beta"])
    return out if Mp == M else out[:M]


# ----------------------------------------------------------------------------
# Parameter prep (once, outside jit): torch (out, in) -> kernel (in, out)
# ----------------------------------------------------------------------------
def prepare_layer_params(raw_layers):
    prepped = []
    for p in raw_layers:
        H = p["q_w"].shape[0]
        prepped.append(dict(
            wqkv=jnp.concatenate([p["q_w"].T, p["k_w"].T, p["v_w"].T], axis=1),
            bqkv=jnp.concatenate([p["q_b"], p["k_b"], p["v_b"]]).reshape(1, 3 * H),
            wao=p["ao_w"].T, bao=p["ao_b"].reshape(1, -1),
            ao_g=p["ao_g"].reshape(1, -1), ao_beta=p["ao_beta"].reshape(1, -1),
            wi=p["i_w"].T, bi=p["i_b"].reshape(1, -1),
            wo=p["o_w"].T, bo=p["o_b"].reshape(1, -1),
            o_g=p["o_g"].reshape(1, -1), o_beta=p["o_beta"].reshape(1, -1),
        ))
    return tuple(prepped)


# ----------------------------------------------------------------------------
# BertLayer / BertEncoder forward (Pallas-backed)
# ----------------------------------------------------------------------------
def _bert_layer(h, mask, p, num_heads):
    B, S, H = h.shape
    attn_out = _attention_block(h, mask, p, num_heads=num_heads)
    out2d = _mlp_block(attn_out.reshape(B * S, H), p)
    return out2d.reshape(B, S, H)


@functools.partial(jax.jit, static_argnames=("num_heads",))
def bert_encoder_forward(hidden_states, attention_mask, layer_params, *,
                         num_heads):
    """BertEncoder.forward with output_all_encoded_layers=True semantics.
    layer_params must be produced by prepare_layer_params()."""
    outs = []
    h = hidden_states
    for p in layer_params:
        h = _bert_layer(h, attention_mask, p, num_heads)
        outs.append(h)
    return outs


# ----------------------------------------------------------------------------
# Pure-JAX reference (matches the PyTorch module, eval mode; torch layout)
# ----------------------------------------------------------------------------
def _reference_encoder(h, mask, layer_params, num_heads):
    P = lax.Precision.HIGHEST
    outs = []
    for p in layer_params:
        B, S, H = h.shape
        d = H // num_heads

        def lin(x, w, b):
            return jnp.einsum("bsh,oh->bso", x, w, precision=P) + b

        def split(t):
            return t.reshape(B, S, num_heads, d).transpose(0, 2, 1, 3)

        def ln(x, g, bb):
            mu = x.mean(-1, keepdims=True)
            var = ((x - mu) ** 2).mean(-1, keepdims=True)
            return (x - mu) / jnp.sqrt(var + LN_EPS) * g + bb

        q = split(lin(h, p["q_w"], p["q_b"]))
        k = split(lin(h, p["k_w"], p["k_b"]))
        v = split(lin(h, p["v_w"], p["v_b"]))
        sc = jnp.einsum("bhqd,bhkd->bhqk", q, k, precision=P) / math.sqrt(d)
        sc = sc + mask
        pr = jax.nn.softmax(sc, axis=-1)
        ctx = jnp.einsum("bhqk,bhkd->bhqd", pr, v, precision=P)
        ctx = ctx.transpose(0, 2, 1, 3).reshape(B, S, H)

        attn_out = ln(lin(ctx, p["ao_w"], p["ao_b"]) + h,
                      p["ao_g"], p["ao_beta"])
        inter = lin(attn_out, p["i_w"], p["i_b"])
        inter = inter * 0.5 * (1.0 + _erf_exact(inter / math.sqrt(2.0)))
        h = ln(lin(inter, p["o_w"], p["o_b"]) + attn_out,
               p["o_g"], p["o_beta"])
        outs.append(h)
    return outs


# ----------------------------------------------------------------------------
# Smoke test
# ----------------------------------------------------------------------------
if __name__ == "__main__":
    B, S, H, NH, L = 2, 8, 32, 4, 2
    I = 4 * H

    key = jax.random.PRNGKey(0)
    key, k_h = jax.random.split(key)
    hidden = jax.random.normal(k_h, (B, S, H), dtype=jnp.float32)

    # Additive attention mask (B, 1, 1, S): mask out the last 2 tokens of batch 1.
    mask = jnp.zeros((B, 1, 1, S), dtype=jnp.float32)
    mask = mask.at[1, :, :, -2:].set(-10000.0)

    def linear_init(k, out_dim, in_dim):
        k1, k2 = jax.random.split(k)
        bound = 1.0 / math.sqrt(in_dim)
        w = jax.random.uniform(k1, (out_dim, in_dim), minval=-bound,
                               maxval=bound, dtype=jnp.float32)
        b = jax.random.uniform(k2, (out_dim,), minval=-bound, maxval=bound,
                               dtype=jnp.float32)
        return w, b

    raw_params = []
    for _ in range(L):
        key, kq, kk, kv, kao, ki, ko, kg = jax.random.split(key, 8)
        qw, qb = linear_init(kq, H, H)
        kw, kb = linear_init(kk, H, H)
        vw, vb = linear_init(kv, H, H)
        aow, aob = linear_init(kao, H, H)
        iw, ib = linear_init(ki, I, H)
        ow, ob = linear_init(ko, H, I)
        g1, g2 = jax.random.split(kg)
        raw_params.append(dict(
            q_w=qw, q_b=qb, k_w=kw, k_b=kb, v_w=vw, v_b=vb,
            ao_w=aow, ao_b=aob,
            ao_g=1.0 + 0.1 * jax.random.normal(g1, (H,), dtype=jnp.float32),
            ao_beta=0.1 * jax.random.normal(g2, (H,), dtype=jnp.float32),
            i_w=iw, i_b=ib,
            o_w=ow, o_b=ob,
            o_g=jnp.ones((H,), dtype=jnp.float32),
            o_beta=jnp.zeros((H,), dtype=jnp.float32),
        ))
    raw_params = tuple(raw_params)

    # One-time weight layout prep (transpose to (K, N), fuse QKV).
    prepped = prepare_layer_params(raw_params)

    outs = bert_encoder_forward(hidden, mask, prepped, num_heads=NH)
    outs = jax.block_until_ready(outs)

    refs = _reference_encoder(hidden, mask, raw_params, NH)
    assert len(outs) == L
    for o, r in zip(outs, refs):
        assert o.shape == (B, S, H)
        assert jnp.allclose(o, r, atol=1e-3, rtol=1e-3), \
            float(jnp.max(jnp.abs(o - r)))

    print("KERNEL_OK")
</pallas_src>

<mosaic_0001>
module attributes {stable_mosaic.version = 11 : i64} {
  func.func @_mlp_block_kernel(%arg0: i32, %arg1: memref<16x32xf32, #tpu.memory_space<vmem>>, %arg2: memref<32x128xf32, #tpu.memory_space<vmem>>, %arg3: memref<1x128xf32, #tpu.memory_space<vmem>>, %arg4: memref<128x32xf32, #tpu.memory_space<vmem>>, %arg5: memref<1x32xf32, #tpu.memory_space<vmem>>, %arg6: memref<1x32xf32, #tpu.memory_space<vmem>>, %arg7: memref<1x32xf32, #tpu.memory_space<vmem>>, %arg8: memref<16x32xf32, #tpu.memory_space<vmem>>) attributes {dimension_semantics = [#tpu.dimension_semantics<parallel>], iteration_bounds = array<i64: 1>, scalar_prefetch = 0 : i64, scratch_operands = 0 : i64, tpu.core_type = #tpu.core_type<tc>, window_params = [{transform_indices = @transform_0, window_bounds = array<i64: 16, 32>}, {pipeline_mode = #tpu.pipeline_mode<synchronous>, transform_indices = @transform_1, window_bounds = array<i64: 32, 128>}, {pipeline_mode = #tpu.pipeline_mode<synchronous>, transform_indices = @transform_2, window_bounds = array<i64: 1, 128>}, {pipeline_mode = #tpu.pipeline_mode<synchronous>, transform_indices = @transform_3, window_bounds = array<i64: 128, 32>}, {pipeline_mode = #tpu.pipeline_mode<synchronous>, transform_indices = @transform_4, window_bounds = array<i64: 1, 32>}, {pipeline_mode = #tpu.pipeline_mode<synchronous>, transform_indices = @transform_5, window_bounds = array<i64: 1, 32>}, {pipeline_mode = #tpu.pipeline_mode<synchronous>, transform_indices = @transform_6, window_bounds = array<i64: 1, 32>}, {transform_indices = @transform_7, window_bounds = array<i64: 16, 32>}]} {
    %c0 = arith.constant 0 : index
    %c0_0 = arith.constant 0 : index
    %0 = vector.load %arg1[%c0, %c0_0] : memref<16x32xf32, #tpu.memory_space<vmem>>, vector<16x32xf32>
    %c0_1 = arith.constant 0 : index
    %c0_2 = arith.constant 0 : index
    %1 = vector.load %arg2[%c0_1, %c0_2] : memref<32x128xf32, #tpu.memory_space<vmem>>, vector<32x128xf32>
    %cst = arith.constant dense<0.000000e+00> : vector<16x128xf32>
    %2 = tpu.matmul %0, %1, %cst {dimension_numbers = #tpu.dot_dimension_numbers<[1], [0], [0], [1], [0, 0, 1, 1], [], []>} : vector<16x32xf32>, vector<32x128xf32>, vector<16x128xf32> -> vector<16x128xf32>
    %c0_3 = arith.constant 0 : index
    %c0_4 = arith.constant 0 : index
    %3 = vector.load %arg3[%c0_3, %c0_4] : memref<1x128xf32, #tpu.memory_space<vmem>>, vector<1x128xf32>
    %4 = vector.broadcast %3 : vector<1x128xf32> to vector<16x128xf32>
    %5 = arith.addf %2, %4 : vector<16x128xf32>
    %cst_5 = arith.constant 5.000000e-01 : f32
    %6 = vector.broadcast %cst_5 : f32 to vector<16x128xf32>
    %7 = arith.mulf %5, %6 : vector<16x128xf32>
    %cst_6 = arith.constant 0.707106769 : f32
    %8 = vector.broadcast %cst_6 : f32 to vector<16x128xf32>
    %9 = arith.mulf %5, %8 : vector<16x128xf32>
    %10 = math.absf %9 : vector<16x128xf32>
    %cst_7 = arith.constant 0.327591091 : f32
    %11 = vector.broadcast %cst_7 : f32 to vector<16x128xf32>
    %12 = arith.mulf %11, %10 : vector<16x128xf32>
    %cst_8 = arith.constant 1.000000e+00 : f32
    %13 = vector.broadcast %cst_8 : f32 to vector<16x128xf32>
    %14 = arith.addf %13, %12 : vector<16x128xf32>
    %cst_9 = arith.constant 1.000000e+00 : f32
    %15 = vector.broadcast %cst_9 : f32 to vector<16x128xf32>
    %16 = arith.divf %15, %14 : vector<16x128xf32>
    %cst_10 = arith.constant 1.06140542 : f32
    %17 = vector.broadcast %cst_10 : f32 to vector<16x128xf32>
    %18 = arith.mulf %17, %16 : vector<16x128xf32>
    %cst_11 = arith.constant 1.45315206 : f32
    %19 = vector.broadcast %cst_11 : f32 to vector<16x128xf32>
    %20 = arith.subf %18, %19 : vector<16x128xf32>
    %21 = arith.mulf %20, %16 : vector<16x128xf32>
    %cst_12 = arith.constant 1.42141378 : f32
    %22 = vector.broadcast %cst_12 : f32 to vector<16x128xf32>
    %23 = arith.addf %21, %22 : vector<16x128xf32>
    %24 = arith.mulf %23, %16 : vector<16x128xf32>
    %cst_13 = arith.constant 0.284496725 : f32
    %25 = vector.broadcast %cst_13 : f32 to vector<16x128xf32>
    %26 = arith.subf %24, %25 : vector<16x128xf32>
    %27 = arith.mulf %26, %16 : vector<16x128xf32>
    %cst_14 = arith.constant 0.254829586 : f32
    %28 = vector.broadcast %cst_14 : f32 to vector<16x128xf32>
    %29 = arith.addf %27, %28 : vector<16x128xf32>
    %30 = arith.mulf %29, %16 : vector<16x128xf32>
    %cst_15 = arith.constant 0.000000e+00 : f32
    %31 = vector.broadcast %cst_15 : f32 to vector<16x128xf32>
    %32 = arith.subf %31, %10 : vector<16x128xf32>
    %33 = arith.mulf %32, %10 : vector<16x128xf32>
    %34 = math.exp %33 : vector<16x128xf32>
    %35 = arith.mulf %30, %34 : vector<16x128xf32>
    %cst_16 = arith.constant 1.000000e+00 : f32
    %36 = vector.broadcast %cst_16 : f32 to vector<16x128xf32>
    %37 = arith.subf %36, %35 : vector<16x128xf32>
    %cst_17 = arith.constant 0.000000e+00 : f32
    %38 = vector.broadcast %cst_17 : f32 to vector<16x128xf32>
    %39 = arith.cmpf olt, %9, %38 : vector<16x128xf32>
    %cst_18 = arith.constant 0.000000e+00 : f32
    %40 = vector.broadcast %cst_18 : f32 to vector<16x128xf32>
    %41 = arith.subf %40, %37 : vector<16x128xf32>
    %42 = arith.select %39, %41, %37 : vector<16x128xi1>, vector<16x128xf32>
    %cst_19 = arith.constant 1.000000e+00 : f32
    %43 = vector.broadcast %cst_19 : f32 to vector<16x128xf32>
    %44 = arith.addf %43, %42 : vector<16x128xf32>
    %45 = arith.mulf %7, %44 : vector<16x128xf32>
    %c0_20 = arith.constant 0 : index
    %c0_21 = arith.constant 0 : index
    %46 = vector.load %arg4[%c0_20, %c0_21] : memref<128x32xf32, #tpu.memory_space<vmem>>, vector<128x32xf32>
    %cst_22 = arith.constant dense<0.000000e+00> : vector<16x32xf32>
    %47 = tpu.matmul %45, %46, %cst_22 {dimension_numbers = #tpu.dot_dimension_numbers<[1], [0], [0], [1], [0, 0, 1, 1], [], []>} : vector<16x128xf32>, vector<128x32xf32>, vector<16x32xf32> -> vector<16x32xf32>
    %c0_23 = arith.constant 0 : index
    %c0_24 = arith.constant 0 : index
    %48 = vector.load %arg5[%c0_23, %c0_24] : memref<1x32xf32, #tpu.memory_space<vmem>>, vector<1x32xf32>
    %49 = vector.broadcast %48 : vector<1x32xf32> to vector<16x32xf32>
    %50 = arith.addf %47, %49 : vector<16x32xf32>
    %51 = arith.addf %50, %0 : vector<16x32xf32>
    %c0_25 = arith.constant 0 : index
    %c0_26 = arith.constant 0 : index
    %52 = vector.load %arg6[%c0_25, %c0_26] : memref<1x32xf32, #tpu.memory_space<vmem>>, vector<1x32xf32>
    %c0_27 = arith.constant 0 : index
    %c0_28 = arith.constant 0 : index
    %53 = vector.load %arg7[%c0_27, %c0_28] : memref<1x32xf32, #tpu.memory_space<vmem>>, vector<1x32xf32>
    %cst_29 = arith.constant dense<0.000000e+00> : vector<16xf32>
    %54 = vector.multi_reduction <add>, %51, %cst_29 [1] : vector<16x32xf32> to vector<16xf32>
    %55 = vector.shape_cast %54 : vector<16xf32> to vector<16x1xf32>
    %cst_30 = arith.constant 3.200000e+01 : f32
    %56 = vector.broadcast %cst_30 : f32 to vector<16x1xf32>
    %57 = arith.divf %55, %56 : vector<16x1xf32>
    %58 = vector.broadcast %57 : vector<16x1xf32> to vector<16x32xf32>
    %59 = arith.subf %51, %58 : vector<16x32xf32>
    %60 = arith.mulf %59, %59 : vector<16x32xf32>
    %cst_31 = arith.constant dense<0.000000e+00> : vector<16xf32>
    %61 = vector.multi_reduction <add>, %60, %cst_31 [1] : vector<16x32xf32> to vector<16xf32>
    %62 = vector.shape_cast %61 : vector<16xf32> to vector<16x1xf32>
    %cst_32 = arith.constant 3.200000e+01 : f32
    %63 = vector.broadcast %cst_32 : f32 to vector<16x1xf32>
    %64 = arith.divf %62, %63 : vector<16x1xf32>
    %cst_33 = arith.constant 9.99999996E-13 : f32
    %65 = vector.broadcast %cst_33 : f32 to vector<16x1xf32>
    %66 = arith.addf %64, %65 : vector<16x1xf32>
    %67 = math.rsqrt %66 : vector<16x1xf32>
    %68 = vector.broadcast %67 : vector<16x1xf32> to vector<16x32xf32>
    %69 = arith.mulf %59, %68 : vector<16x32xf32>
    %70 = vector.broadcast %52 : vector<1x32xf32> to vector<16x32xf32>
    %71 = arith.mulf %69, %70 : vector<16x32xf32>
    %72 = vector.broadcast %53 : vector<1x32xf32> to vector<16x32xf32>
    %73 = arith.addf %71, %72 : vector<16x32xf32>
    %c0_34 = arith.constant 0 : index
    %c0_35 = arith.constant 0 : index
    %74 = vector.load %arg8[%c0_34, %c0_35] : memref<16x32xf32, #tpu.memory_space<vmem>>, vector<16x32xf32>
    tpu.vector_store %arg8[%c0_34, %c0_35], %73 {strides = array<i32>} : memref<16x32xf32, #tpu.memory_space<vmem>>, vector<16x32xf32>,
    return
  }
  func.func @transform_0(%arg0: i32) -> (i32, i32) {
    %c0_i32 = arith.constant 0 : i32
    %c0_i32_0 = arith.constant 0 : i32
    return %arg0, %c0_i32 : i32, i32
  }
  func.func @transform_1(%arg0: i32) -> (i32, i32) {
    %c0_i32 = arith.constant 0 : i32
    %c0_i32_0 = arith.constant 0 : i32
    %c0_i32_1 = arith.constant 0 : i32
    return %c0_i32, %c0_i32_0 : i32, i32
  }
  func.func @transform_2(%arg0: i32) -> (i32, i32) {
    %c0_i32 = arith.constant 0 : i32
    %c0_i32_0 = arith.constant 0 : i32
    %c0_i32_1 = arith.constant 0 : i32
    return %c0_i32, %c0_i32_0 : i32, i32
  }
  func.func @transform_3(%arg0: i32) -> (i32, i32) {
    %c0_i32 = arith.constant 0 : i32
    %c0_i32_0 = arith.constant 0 : i32
    %c0_i32_1 = arith.constant 0 : i32
    return %c0_i32, %c0_i32_0 : i32, i32
  }
  func.func @transform_4(%arg0: i32) -> (i32, i32) {
    %c0_i32 = arith.constant 0 : i32
    %c0_i32_0 = arith.constant 0 : i32
    %c0_i32_1 = arith.constant 0 : i32
    return %c0_i32, %c0_i32_0 : i32, i32
  }
  func.func @transform_5(%arg0: i32) -> (i32, i32) {
    %c0_i32 = arith.constant 0 : i32
    %c0_i32_0 = arith.constant 0 : i32
    %c0_i32_1 = arith.constant 0 : i32
    return %c0_i32, %c0_i32_0 : i32, i32
  }
  func.func @transform_6(%arg0: i32) -> (i32, i32) {
    %c0_i32 = arith.constant 0 : i32
    %c0_i32_0 = arith.constant 0 : i32
    %c0_i32_1 = arith.constant 0 : i32
    return %c0_i32, %c0_i32_0 : i32, i32
  }
  func.func @transform_7(%arg0: i32) -> (i32, i32) {
    %c0_i32 = arith.constant 0 : i32
    %c0_i32_0 = arith.constant 0 : i32
    return %arg0, %c0_i32 : i32, i32
  }
}

module attributes {stable_mosaic.version = 11 : i64} {
  func.func @_attn_block_kernel(%arg0: i32, %arg1: memref<1x8x32xf32, #tpu.memory_space<vmem>>, %arg2: memref<1x1x1x8xf32, #tpu.memory_space<vmem>>, %arg3: memref<32x96xf32, #tpu.memory_space<vmem>>, %arg4: memref<1x96xf32, #tpu.memory_space<vmem>>, %arg5: memref<32x32xf32, #tpu.memory_space<vmem>>, %arg6: memref<1x32xf32, #tpu.memory_space<vmem>>, %arg7: memref<1x32xf32, #tpu.memory_space<vmem>>, %arg8: memref<1x32xf32, #tpu.memory_space<vmem>>, %arg9: memref<1x8x32xf32, #tpu.memory_space<vmem>>) attributes {dimension_semantics = [#tpu.dimension_semantics<parallel>], iteration_bounds = array<i64: 2>, scalar_prefetch = 0 : i64, scratch_operands = 0 : i64, tpu.core_type = #tpu.core_type<tc>, window_params = [{transform_indices = @transform_0, window_bounds = array<i64: 1, 8, 32>}, {transform_indices = @transform_1, window_bounds = array<i64: 1, 1, 1, 8>}, {pipeline_mode = #tpu.pipeline_mode<synchronous>, transform_indices = @transform_2, window_bounds = array<i64: 32, 96>}, {pipeline_mode = #tpu.pipeline_mode<synchronous>, transform_indices = @transform_3, window_bounds = array<i64: 1, 96>}, {pipeline_mode = #tpu.pipeline_mode<synchronous>, transform_indices = @transform_4, window_bounds = array<i64: 32, 32>}, {pipeline_mode = #tpu.pipeline_mode<synchronous>, transform_indices = @transform_5, window_bounds = array<i64: 1, 32>}, {pipeline_mode = #tpu.pipeline_mode<synchronous>, transform_indices = @transform_6, window_bounds = array<i64: 1, 32>}, {pipeline_mode = #tpu.pipeline_mode<synchronous>, transform_indices = @transform_7, window_bounds = array<i64: 1, 32>}, {transform_indices = @transform_8, window_bounds = array<i64: 1, 8, 32>}]} {
    %c0 = arith.constant 0 : index
    %c0_0 = arith.constant 0 : index
    %c0_1 = arith.constant 0 : index
    %0 = vector.load %arg1[%c0, %c0_0, %c0_1] : memref<1x8x32xf32, #tpu.memory_space<vmem>>, vector<1x8x32xf32>
    %1 = vector.shape_cast %0 : vector<1x8x32xf32> to vector<8x32xf32>
    %c0_2 = arith.constant 0 : index
    %c0_3 = arith.constant 0 : index
    %c0_4 = arith.constant 0 : index
    %c0_5 = arith.constant 0 : index
    %2 = vector.load %arg2[%c0_2, %c0_3, %c0_4, %c0_5] : memref<1x1x1x8xf32, #tpu.memory_space<vmem>>, vector<1x1x1x8xf32>
    %3 = vector.shape_cast %2 : vector<1x1x1x8xf32> to vector<1x8xf32>
    %c0_6 = arith.constant 0 : index
    %c0_7 = arith.constant 0 : index
    %4 = vector.load %arg3[%c0_6, %c0_7] : memref<32x96xf32, #tpu.memory_space<vmem>>, vector<32x96xf32>
    %cst = arith.constant dense<0.000000e+00> : vector<8x96xf32>
    %5 = tpu.matmul %1, %4, %cst {dimension_numbers = #tpu.dot_dimension_numbers<[1], [0], [0], [1], [0, 0, 1, 1], [], []>} : vector<8x32xf32>, vector<32x96xf32>, vector<8x96xf32> -> vector<8x96xf32>
    %c0_8 = arith.constant 0 : index
    %c0_9 = arith.constant 0 : index
    %6 = vector.load %arg4[%c0_8, %c0_9] : memref<1x96xf32, #tpu.memory_space<vmem>>, vector<1x96xf32>
    %7 = vector.broadcast %6 : vector<1x96xf32> to vector<8x96xf32>
    %8 = arith.addf %5, %7 : vector<8x96xf32>
    %9 = vector.extract_strided_slice %8 {offsets = [0, 0], sizes = [8, 8], strides = [1, 1]} : vector<8x96xf32> to vector<8x8xf32>
    %10 = vector.extract_strided_slice %8 {offsets = [0, 32], sizes = [8, 8], strides = [1, 1]} : vector<8x96xf32> to vector<8x8xf32>
    %11 = vector.extract_strided_slice %8 {offsets = [0, 64], sizes = [8, 8], strides = [1, 1]} : vector<8x96xf32> to vector<8x8xf32>
    %cst_10 = arith.constant dense<0.000000e+00> : vector<8x8xf32>
    %12 = tpu.matmul %9, %10, %cst_10 {dimension_numbers = #tpu.dot_dimension_numbers<[1], [1], [0], [0], [0, 0, 1, 0], [], []>} : vector<8x8xf32>, vector<8x8xf32>, vector<8x8xf32> -> vector<8x8xf32>
    %cst_11 = arith.constant 0.353553385 : f32
    %13 = vector.broadcast %cst_11 : f32 to vector<8x8xf32>
    %14 = arith.mulf %12, %13 : vector<8x8xf32>
    %15 = vector.broadcast %3 : vector<1x8xf32> to vector<8x8xf32>
    %16 = arith.addf %14, %15 : vector<8x8xf32>
    %cst_12 = arith.constant dense<0xFF800000> : vector<8xf32>
    %17 = vector.multi_reduction <maximumf>, %16, %cst_12 [1] : vector<8x8xf32> to vector<8xf32>
    %18 = vector.shape_cast %17 : vector<8xf32> to vector<8x1xf32>
    %19 = vector.broadcast %18 : vector<8x1xf32> to vector<8x8xf32>
    %20 = arith.subf %16, %19 : vector<8x8xf32>
    %21 = math.exp %20 : vector<8x8xf32>
    %cst_13 = arith.constant dense<0.000000e+00> : vector<8xf32>
    %22 = vector.multi_reduction <add>, %21, %cst_13 [1] : vector<8x8xf32> to vector<8xf32>
    %23 = vector.shape_cast %22 : vector<8xf32> to vector<8x1xf32>
    %cst_14 = arith.constant dense<0.000000e+00> : vector<8x8xf32>
    %24 = tpu.matmul %21, %11, %cst_14 {dimension_numbers = #tpu.dot_dimension_numbers<[1], [0], [0], [1], [0, 0, 1, 1], [], []>} : vector<8x8xf32>, vector<8x8xf32>, vector<8x8xf32> -> vector<8x8xf32>
    %25 = tpu.reciprocal %23 : vector<8x1xf32> -> vector<8x1xf32>
    %26 = vector.broadcast %25 : vector<8x1xf32> to vector<8x8xf32>
    %27 = arith.mulf %24, %26 : vector<8x8xf32>
    %28 = vector.extract_strided_slice %8 {offsets = [0, 8], sizes = [8, 8], strides = [1, 1]} : vector<8x96xf32> to vector<8x8xf32>
    %29 = vector.extract_strided_slice %8 {offsets = [0, 40], sizes = [8, 8], strides = [1, 1]} : vector<8x96xf32> to vector<8x8xf32>
    %30 = vector.extract_strided_slice %8 {offsets = [0, 72], sizes = [8, 8], strides = [1, 1]} : vector<8x96xf32> to vector<8x8xf32>
    %cst_15 = arith.constant dense<0.000000e+00> : vector<8x8xf32>
    %31 = tpu.matmul %28, %29, %cst_15 {dimension_numbers = #tpu.dot_dimension_numbers<[1], [1], [0], [0], [0, 0, 1, 0], [], []>} : vector<8x8xf32>, vector<8x8xf32>, vector<8x8xf32> -> vector<8x8xf32>
    %cst_16 = arith.constant 0.353553385 : f32
    %32 = vector.broadcast %cst_16 : f32 to vector<8x8xf32>
    %33 = arith.mulf %31, %32 : vector<8x8xf32>
    %34 = vector.broadcast %3 : vector<1x8xf32> to vector<8x8xf32>
    %35 = arith.addf %33, %34 : vector<8x8xf32>
    %cst_17 = arith.constant dense<0xFF800000> : vector<8xf32>
    %36 = vector.multi_reduction <maximumf>, %35, %cst_17 [1] : vector<8x8xf32> to vector<8xf32>
    %37 = vector.shape_cast %36 : vector<8xf32> to vector<8x1xf32>
    %38 = vector.broadcast %37 : vector<8x1xf32> to vector<8x8xf32>
    %39 = arith.subf %35, %38 : vector<8x8xf32>
    %40 = math.exp %39 : vector<8x8xf32>
    %cst_18 = arith.constant dense<0.000000e+00> : vector<8xf32>
    %41 = vector.multi_reduction <add>, %40, %cst_18 [1] : vector<8x8xf32> to vector<8xf32>
    %42 = vector.shape_cast %41 : vector<8xf32> to vector<8x1xf32>
    %cst_19 = arith.constant dense<0.000000e+00> : vector<8x8xf32>
    %43 = tpu.matmul %40, %30, %cst_19 {dimension_numbers = #tpu.dot_dimension_numbers<[1], [0], [0], [1], [0, 0, 1, 1], [], []>} : vector<8x8xf32>, vector<8x8xf32>, vector<8x8xf32> -> vector<8x8xf32>
    %44 = tpu.reciprocal %42 : vector<8x1xf32> -> vector<8x1xf32>
    %45 = vector.broadcast %44 : vector<8x1xf32> to vector<8x8xf32>
    %46 = arith.mulf %43, %45 : vector<8x8xf32>
    %47 = vector.extract_strided_slice %8 {offsets = [0, 16], sizes = [8, 8], strides = [1, 1]} : vector<8x96xf32> to vector<8x8xf32>
    %48 = vector.extract_strided_slice %8 {offsets = [0, 48], sizes = [8, 8], strides = [1, 1]} : vector<8x96xf32> to vector<8x8xf32>
    %49 = vector.extract_strided_slice %8 {offsets = [0, 80], sizes = [8, 8], strides = [1, 1]} : vector<8x96xf32> to vector<8x8xf32>
    %cst_20 = arith.constant dense<0.000000e+00> : vector<8x8xf32>
    %50 = tpu.matmul %47, %48, %cst_20 {dimension_numbers = #tpu.dot_dimension_numbers<[1], [1], [0], [0], [0, 0, 1, 0], [], []>} : vector<8x8xf32>, vector<8x8xf32>, vector<8x8xf32> -> vector<8x8xf32>
    %cst_21 = arith.constant 0.353553385 : f32
    %51 = vector.broadcast %cst_21 : f32 to vector<8x8xf32>
    %52 = arith.mulf %50, %51 : vector<8x8xf32>
    %53 = vector.broadcast %3 : vector<1x8xf32> to vector<8x8xf32>
    %54 = arith.addf %52, %53 : vector<8x8xf32>
    %cst_22 = arith.constant dense<0xFF800000> : vector<8xf32>
    %55 = vector.multi_reduction <maximumf>, %54, %cst_22 [1] : vector<8x8xf32> to vector<8xf32>
    %56 = vector.shape_cast %55 : vector<8xf32> to vector<8x1xf32>
    %57 = vector.broadcast %56 : vector<8x1xf32> to vector<8x8xf32>
    %58 = arith.subf %54, %57 : vector<8x8xf32>
    %59 = math.exp %58 : vector<8x8xf32>
    %cst_23 = arith.constant dense<0.000000e+00> : vector<8xf32>
    %60 = vector.multi_reduction <add>, %59, %cst_23 [1] : vector<8x8xf32> to vector<8xf32>
    %61 = vector.shape_cast %60 : vector<8xf32> to vector<8x1xf32>
    %cst_24 = arith.constant dense<0.000000e+00> : vector<8x8xf32>
    %62 = tpu.matmul %59, %49, %cst_24 {dimension_numbers = #tpu.dot_dimension_numbers<[1], [0], [0], [1], [0, 0, 1, 1], [], []>} : vector<8x8xf32>, vector<8x8xf32>, vector<8x8xf32> -> vector<8x8xf32>
    %63 = tpu.reciprocal %61 : vector<8x1xf32> -> vector<8x1xf32>
    %64 = vector.broadcast %63 : vector<8x1xf32> to vector<8x8xf32>
    %65 = arith.mulf %62, %64 : vector<8x8xf32>
    %66 = vector.extract_strided_slice %8 {offsets = [0, 24], sizes = [8, 8], strides = [1, 1]} : vector<8x96xf32> to vector<8x8xf32>
    %67 = vector.extract_strided_slice %8 {offsets = [0, 56], sizes = [8, 8], strides = [1, 1]} : vector<8x96xf32> to vector<8x8xf32>
    %68 = vector.extract_strided_slice %8 {offsets = [0, 88], sizes = [8, 8], strides = [1, 1]} : vector<8x96xf32> to vector<8x8xf32>
    %cst_25 = arith.constant dense<0.000000e+00> : vector<8x8xf32>
    %69 = tpu.matmul %66, %67, %cst_25 {dimension_numbers = #tpu.dot_dimension_numbers<[1], [1], [0], [0], [0, 0, 1, 0], [], []>} : vector<8x8xf32>, vector<8x8xf32>, vector<8x8xf32> -> vector<8x8xf32>
    %cst_26 = arith.constant 0.353553385 : f32
    %70 = vector.broadcast %cst_26 : f32 to vector<8x8xf32>
    %71 = arith.mulf %69, %70 : vector<8x8xf32>
    %72 = vector.broadcast %3 : vector<1x8xf32> to vector<8x8xf32>
    %73 = arith.addf %71, %72 : vector<8x8xf32>
    %cst_27 = arith.constant dense<0xFF800000> : vector<8xf32>
    %74 = vector.multi_reduction <maximumf>, %73, %cst_27 [1] : vector<8x8xf32> to vector<8xf32>
    %75 = vector.shape_cast %74 : vector<8xf32> to vector<8x1xf32>
    %76 = vector.broadcast %75 : vector<8x1xf32> to vector<8x8xf32>
    %77 = arith.subf %73, %76 : vector<8x8xf32>
    %78 = math.exp %77 : vector<8x8xf32>
    %cst_28 = arith.constant dense<0.000000e+00> : vector<8xf32>
    %79 = vector.multi_reduction <add>, %78, %cst_28 [1] : vector<8x8xf32> to vector<8xf32>
    %80 = vector.shape_cast %79 : vector<8xf32> to vector<8x1xf32>
    %cst_29 = arith.constant dense<0.000000e+00> : vector<8x8xf32>
    %81 = tpu.matmul %78, %68, %cst_29 {dimension_numbers = #tpu.dot_dimension_numbers<[1], [0], [0], [1], [0, 0, 1, 1], [], []>} : vector<8x8xf32>, vector<8x8xf32>, vector<8x8xf32> -> vector<8x8xf32>
    %82 = tpu.reciprocal %80 : vector<8x1xf32> -> vector<8x1xf32>
    %83 = vector.broadcast %82 : vector<8x1xf32> to vector<8x8xf32>
    %84 = arith.mulf %81, %83 : vector<8x8xf32>
    %85 = tpu.concatenate %27, %46, %65, %84 in 1 : vector<8x8xf32>, vector<8x8xf32>, vector<8x8xf32>, vector<8x8xf32> -> vector<8x32xf32>
    %c0_30 = arith.constant 0 : index
    %c0_31 = arith.constant 0 : index
    %86 = vector.load %arg5[%c0_30, %c0_31] : memref<32x32xf32, #tpu.memory_space<vmem>>, vector<32x32xf32>
    %cst_32 = arith.constant dense<0.000000e+00> : vector<8x32xf32>
    %87 = tpu.matmul %85, %86, %cst_32 {dimension_numbers = #tpu.dot_dimension_numbers<[1], [0], [0], [1], [0, 0, 1, 1], [], []>} : vector<8x32xf32>, vector<32x32xf32>, vector<8x32xf32> -> vector<8x32xf32>
    %c0_33 = arith.constant 0 : index
    %c0_34 = arith.constant 0 : index
    %88 = vector.load %arg6[%c0_33, %c0_34] : memref<1x32xf32, #tpu.memory_space<vmem>>, vector<1x32xf32>
    %89 = vector.broadcast %88 : vector<1x32xf32> to vector<8x32xf32>
    %90 = arith.addf %87, %89 : vector<8x32xf32>
    %91 = arith.addf %90, %1 : vector<8x32xf32>
    %c0_35 = arith.constant 0 : index
    %c0_36 = arith.constant 0 : index
    %92 = vector.load %arg7[%c0_35, %c0_36] : memref<1x32xf32, #tpu.memory_space<vmem>>, vector<1x32xf32>
    %c0_37 = arith.constant 0 : index
    %c0_38 = arith.constant 0 : index
    %93 = vector.load %arg8[%c0_37, %c0_38] : memref<1x32xf32, #tpu.memory_space<vmem>>, vector<1x32xf32>
    %cst_39 = arith.constant dense<0.000000e+00> : vector<8xf32>
    %94 = vector.multi_reduction <add>, %91, %cst_39 [1] : vector<8x32xf32> to vector<8xf32>
    %95 = vector.shape_cast %94 : vector<8xf32> to vector<8x1xf32>
    %cst_40 = arith.constant 3.200000e+01 : f32
    %96 = vector.broadcast %cst_40 : f32 to vector<8x1xf32>
    %97 = arith.divf %95, %96 : vector<8x1xf32>
    %98 = vector.broadcast %97 : vector<8x1xf32> to vector<8x32xf32>
    %99 = arith.subf %91, %98 : vector<8x32xf32>
    %100 = arith.mulf %99, %99 : vector<8x32xf32>
    %cst_41 = arith.constant dense<0.000000e+00> : vector<8xf32>
    %101 = vector.multi_reduction <add>, %100, %cst_41 [1] : vector<8x32xf32> to vector<8xf32>
    %102 = vector.shape_cast %101 : vector<8xf32> to vector<8x1xf32>
    %cst_42 = arith.constant 3.200000e+01 : f32
    %103 = vector.broadcast %cst_42 : f32 to vector<8x1xf32>
    %104 = arith.divf %102, %103 : vector<8x1xf32>
    %cst_43 = arith.constant 9.99999996E-13 : f32
    %105 = vector.broadcast %cst_43 : f32 to vector<8x1xf32>
    %106 = arith.addf %104, %105 : vector<8x1xf32>
    %107 = math.rsqrt %106 : vector<8x1xf32>
    %108 = vector.broadcast %107 : vector<8x1xf32> to vector<8x32xf32>
    %109 = arith.mulf %99, %108 : vector<8x32xf32>
    %110 = vector.broadcast %92 : vector<1x32xf32> to vector<8x32xf32>
    %111 = arith.mulf %109, %110 : vector<8x32xf32>
    %112 = vector.broadcast %93 : vector<1x32xf32> to vector<8x32xf32>
    %113 = arith.addf %111, %112 : vector<8x32xf32>
    %c0_44 = arith.constant 0 : index
    %c0_45 = arith.constant 0 : index
    %c0_46 = arith.constant 0 : index
    %114 = vector.load %arg9[%c0_44, %c0_45, %c0_46] : memref<1x8x32xf32, #tpu.memory_space<vmem>>, vector<1x8x32xf32>
    %115 = vector.shape_cast %114 : vector<1x8x32xf32> to vector<8x32xf32>
    %116 = vector.shape_cast %113 : vector<8x32xf32> to vector<1x8x32xf32>
    tpu.vector_store %arg9[%c0_44, %c0_45, %c0_46], %116 {strides = array<i32>} : memref<1x8x32xf32, #tpu.memory_space<vmem>>, vector<1x8x32xf32>,
    return
  }
  func.func @transform_0(%arg0: i32) -> (i32, i32, i32) {
    %c0_i32 = arith.constant 0 : i32
    %c0_i32_0 = arith.constant 0 : i32
    %c0_i32_1 = arith.constant 0 : i32
    return %arg0, %c0_i32, %c0_i32_0 : i32, i32, i32
  }
  func.func @transform_1(%arg0: i32) -> (i32, i32, i32, i32) {
    %c0_i32 = arith.constant 0 : i32
    %c0_i32_0 = arith.constant 0 : i32
    %c0_i32_1 = arith.constant 0 : i32
    %c0_i32_2 = arith.constant 0 : i32
    return %arg0, %c0_i32, %c0_i32_0, %c0_i32_1 : i32, i32, i32, i32
  }
  func.func @transform_2(%arg0: i32) -> (i32, i32) {
    %c0_i32 = arith.constant 0 : i32
    %c0_i32_0 = arith.constant 0 : i32
    %c0_i32_1 = arith.constant 0 : i32
    return %c0_i32, %c0_i32_0 : i32, i32
  }
  func.func @transform_3(%arg0: i32) -> (i32, i32) {
    %c0_i32 = arith.constant 0 : i32
    %c0_i32_0 = arith.constant 0 : i32
    %c0_i32_1 = arith.constant 0 : i32
    return %c0_i32, %c0_i32_0 : i32, i32
  }
  func.func @transform_4(%arg0: i32) -> (i32, i32) {
    %c0_i32 = arith.constant 0 : i32
    %c0_i32_0 = arith.constant 0 : i32
    %c0_i32_1 = arith.constant 0 : i32
    return %c0_i32, %c0_i32_0 : i32, i32
  }
  func.func @transform_5(%arg0: i32) -> (i32, i32) {
    %c0_i32 = arith.constant 0 : i32
    %c0_i32_0 = arith.constant 0 : i32
    %c0_i32_1 = arith.constant 0 : i32
    return %c0_i32, %c0_i32_0 : i32, i32
  }
  func.func @transform_6(%arg0: i32) -> (i32, i32) {
    %c0_i32 = arith.constant 0 : i32
    %c0_i32_0 = arith.constant 0 : i32
    %c0_i32_1 = arith.constant 0 : i32
    return %c0_i32, %c0_i32_0 : i32, i32
  }
  func.func @transform_7(%arg0: i32) -> (i32, i32) {
    %c0_i32 = arith.constant 0 : i32
    %c0_i32_0 = arith.constant 0 : i32
    %c0_i32_1 = arith.constant 0 : i32
    return %c0_i32, %c0_i32_0 : i32, i32
  }
  func.func @transform_8(%arg0: i32) -> (i32, i32, i32) {
    %c0_i32 = arith.constant 0 : i32
    %c0_i32_0 = arith.constant 0 : i32
    %c0_i32_1 = arith.constant 0 : i32
    return %arg0, %c0_i32, %c0_i32_0 : i32, i32, i32
  }
}

module attributes {stable_mosaic.version = 11 : i64} {
  func.func @_attn_block_kernel(%arg0: i32, %arg1: memref<1x8x32xf32, #tpu.memory_space<vmem>>, %arg2: memref<1x1x1x8xf32, #tpu.memory_space<vmem>>, %arg3: memref<32x96xf32, #tpu.memory_space<vmem>>, %arg4: memref<1x96xf32, #tpu.memory_space<vmem>>, %arg5: memref<32x32xf32, #tpu.memory_space<vmem>>, %arg6: memref<1x32xf32, #tpu.memory_space<vmem>>, %arg7: memref<1x32xf32, #tpu.memory_space<vmem>>, %arg8: memref<1x32xf32, #tpu.memory_space<vmem>>, %arg9: memref<1x8x32xf32, #tpu.memory_space<vmem>>) attributes {dimension_semantics = [#tpu.dimension_semantics<parallel>], iteration_bounds = array<i64: 2>, scalar_prefetch = 0 : i64, scratch_operands = 0 : i64, tpu.core_type = #tpu.core_type<tc>, window_params = [{transform_indices = @transform_0, window_bounds = array<i64: 1, 8, 32>}, {transform_indices = @transform_1, window_bounds = array<i64: 1, 1, 1, 8>}, {pipeline_mode = #tpu.pipeline_mode<synchronous>, transform_indices = @transform_2, window_bounds = array<i64: 32, 96>}, {pipeline_mode = #tpu.pipeline_mode<synchronous>, transform_indices = @transform_3, window_bounds = array<i64: 1, 96>}, {pipeline_mode = #tpu.pipeline_mode<synchronous>, transform_indices = @transform_4, window_bounds = array<i64: 32, 32>}, {pipeline_mode = #tpu.pipeline_mode<synchronous>, transform_indices = @transform_5, window_bounds = array<i64: 1, 32>}, {pipeline_mode = #tpu.pipeline_mode<synchronous>, transform_indices = @transform_6, window_bounds = array<i64: 1, 32>}, {pipeline_mode = #tpu.pipeline_mode<synchronous>, transform_indices = @transform_7, window_bounds = array<i64: 1, 32>}, {transform_indices = @transform_8, window_bounds = array<i64: 1, 8, 32>}]} {
    %c0 = arith.constant 0 : index
    %c0_0 = arith.constant 0 : index
    %c0_1 = arith.constant 0 : index
    %0 = vector.load %arg1[%c0, %c0_0, %c0_1] : memref<1x8x32xf32, #tpu.memory_space<vmem>>, vector<1x8x32xf32>
    %1 = vector.shape_cast %0 : vector<1x8x32xf32> to vector<8x32xf32>
    %c0_2 = arith.constant 0 : index
    %c0_3 = arith.constant 0 : index
    %c0_4 = arith.constant 0 : index
    %c0_5 = arith.constant 0 : index
    %2 = vector.load %arg2[%c0_2, %c0_3, %c0_4, %c0_5] : memref<1x1x1x8xf32, #tpu.memory_space<vmem>>, vector<1x1x1x8xf32>
    %3 = vector.shape_cast %2 : vector<1x1x1x8xf32> to vector<1x8xf32>
    %c0_6 = arith.constant 0 : index
    %c0_7 = arith.constant 0 : index
    %4 = vector.load %arg3[%c0_6, %c0_7] : memref<32x96xf32, #tpu.memory_space<vmem>>, vector<32x96xf32>
    %cst = arith.constant dense<0.000000e+00> : vector<8x96xf32>
    %5 = tpu.matmul %1, %4, %cst {dimension_numbers = #tpu.dot_dimension_numbers<[1], [0], [0], [1], [0, 0, 1, 1], [], []>} : vector<8x32xf32>, vector<32x96xf32>, vector<8x96xf32> -> vector<8x96xf32>
    %c0_8 = arith.constant 0 : index
    %c0_9 = arith.constant 0 : index
    %6 = vector.load %arg4[%c0_8, %c0_9] : memref<1x96xf32, #tpu.memory_space<vmem>>, vector<1x96xf32>
    %7 = vector.broadcast %6 : vector<1x96xf32> to vector<8x96xf32>
    %8 = arith.addf %5, %7 : vector<8x96xf32>
    %9 = vector.extract_strided_slice %8 {offsets = [0, 0], sizes = [8, 8], strides = [1, 1]} : vector<8x96xf32> to vector<8x8xf32>
    %10 = vector.extract_strided_slice %8 {offsets = [0, 32], sizes = [8, 8], strides = [1, 1]} : vector<8x96xf32> to vector<8x8xf32>
    %11 = vector.extract_strided_slice %8 {offsets = [0, 64], sizes = [8, 8], strides = [1, 1]} : vector<8x96xf32> to vector<8x8xf32>
    %cst_10 = arith.constant dense<0.000000e+00> : vector<8x8xf32>
    %12 = tpu.matmul %9, %10, %cst_10 {dimension_numbers = #tpu.dot_dimension_numbers<[1], [1], [0], [0], [0, 0, 1, 0], [], []>} : vector<8x8xf32>, vector<8x8xf32>, vector<8x8xf32> -> vector<8x8xf32>
    %cst_11 = arith.constant 0.353553385 : f32
    %13 = vector.broadcast %cst_11 : f32 to vector<8x8xf32>
    %14 = arith.mulf %12, %13 : vector<8x8xf32>
    %15 = vector.broadcast %3 : vector<1x8xf32> to vector<8x8xf32>
    %16 = arith.addf %14, %15 : vector<8x8xf32>
    %cst_12 = arith.constant dense<0xFF800000> : vector<8xf32>
    %17 = vector.multi_reduction <maximumf>, %16, %cst_12 [1] : vector<8x8xf32> to vector<8xf32>
    %18 = vector.shape_cast %17 : vector<8xf32> to vector<8x1xf32>
    %19 = vector.broadcast %18 : vector<8x1xf32> to vector<8x8xf32>
    %20 = arith.subf %16, %19 : vector<8x8xf32>
    %21 = math.exp %20 : vector<8x8xf32>
    %cst_13 = arith.constant dense<0.000000e+00> : vector<8xf32>
    %22 = vector.multi_reduction <add>, %21, %cst_13 [1] : vector<8x8xf32> to vector<8xf32>
    %23 = vector.shape_cast %22 : vector<8xf32> to vector<8x1xf32>
    %cst_14 = arith.constant dense<0.000000e+00> : vector<8x8xf32>
    %24 = tpu.matmul %21, %11, %cst_14 {dimension_numbers = #tpu.dot_dimension_numbers<[1], [0], [0], [1], [0, 0, 1, 1], [], []>} : vector<8x8xf32>, vector<8x8xf32>, vector<8x8xf32> -> vector<8x8xf32>
    %25 = tpu.reciprocal %23 : vector<8x1xf32> -> vector<8x1xf32>
    %26 = vector.broadcast %25 : vector<8x1xf32> to vector<8x8xf32>
    %27 = arith.mulf %24, %26 : vector<8x8xf32>
    %28 = vector.extract_strided_slice %8 {offsets = [0, 8], sizes = [8, 8], strides = [1, 1]} : vector<8x96xf32> to vector<8x8xf32>
    %29 = vector.extract_strided_slice %8 {offsets = [0, 40], sizes = [8, 8], strides = [1, 1]} : vector<8x96xf32> to vector<8x8xf32>
    %30 = vector.extract_strided_slice %8 {offsets = [0, 72], sizes = [8, 8], strides = [1, 1]} : vector<8x96xf32> to vector<8x8xf32>
    %cst_15 = arith.constant dense<0.000000e+00> : vector<8x8xf32>
    %31 = tpu.matmul %28, %29, %cst_15 {dimension_numbers = #tpu.dot_dimension_numbers<[1], [1], [0], [0], [0, 0, 1, 0], [], []>} : vector<8x8xf32>, vector<8x8xf32>, vector<8x8xf32> -> vector<8x8xf32>
    %cst_16 = arith.constant 0.353553385 : f32
    %32 = vector.broadcast %cst_16 : f32 to vector<8x8xf32>
    %33 = arith.mulf %31, %32 : vector<8x8xf32>
    %34 = vector.broadcast %3 : vector<1x8xf32> to vector<8x8xf32>
    %35 = arith.addf %33, %34 : vector<8x8xf32>
    %cst_17 = arith.constant dense<0xFF800000> : vector<8xf32>
    %36 = vector.multi_reduction <maximumf>, %35, %cst_17 [1] : vector<8x8xf32> to vector<8xf32>
    %37 = vector.shape_cast %36 : vector<8xf32> to vector<8x1xf32>
    %38 = vector.broadcast %37 : vector<8x1xf32> to vector<8x8xf32>
    %39 = arith.subf %35, %38 : vector<8x8xf32>
    %40 = math.exp %39 : vector<8x8xf32>
    %cst_18 = arith.constant dense<0.000000e+00> : vector<8xf32>
    %41 = vector.multi_reduction <add>, %40, %cst_18 [1] : vector<8x8xf32> to vector<8xf32>
    %42 = vector.shape_cast %41 : vector<8xf32> to vector<8x1xf32>
    %cst_19 = arith.constant dense<0.000000e+00> : vector<8x8xf32>
    %43 = tpu.matmul %40, %30, %cst_19 {dimension_numbers = #tpu.dot_dimension_numbers<[1], [0], [0], [1], [0, 0, 1, 1], [], []>} : vector<8x8xf32>, vector<8x8xf32>, vector<8x8xf32> -> vector<8x8xf32>
    %44 = tpu.reciprocal %42 : vector<8x1xf32> -> vector<8x1xf32>
    %45 = vector.broadcast %44 : vector<8x1xf32> to vector<8x8xf32>
    %46 = arith.mulf %43, %45 : vector<8x8xf32>
    %47 = vector.extract_strided_slice %8 {offsets = [0, 16], sizes = [8, 8], strides = [1, 1]} : vector<8x96xf32> to vector<8x8xf32>
    %48 = vector.extract_strided_slice %8 {offsets = [0, 48], sizes = [8, 8], strides = [1, 1]} : vector<8x96xf32> to vector<8x8xf32>
    %49 = vector.extract_strided_slice %8 {offsets = [0, 80], sizes = [8, 8], strides = [1, 1]} : vector<8x96xf32> to vector<8x8xf32>
    %cst_20 = arith.constant dense<0.000000e+00> : vector<8x8xf32>
    %50 = tpu.matmul %47, %48, %cst_20 {dimension_numbers = #tpu.dot_dimension_numbers<[1], [1], [0], [0], [0, 0, 1, 0], [], []>} : vector<8x8xf32>, vector<8x8xf32>, vector<8x8xf32> -> vector<8x8xf32>
    %cst_21 = arith.constant 0.353553385 : f32
    %51 = vector.broadcast %cst_21 : f32 to vector<8x8xf32>
    %52 = arith.mulf %50, %51 : vector<8x8xf32>
    %53 = vector.broadcast %3 : vector<1x8xf32> to vector<8x8xf32>
    %54 = arith.addf %52, %53 : vector<8x8xf32>
    %cst_22 = arith.constant dense<0xFF800000> : vector<8xf32>
    %55 = vector.multi_reduction <maximumf>, %54, %cst_22 [1] : vector<8x8xf32> to vector<8xf32>
    %56 = vector.shape_cast %55 : vector<8xf32> to vector<8x1xf32>
    %57 = vector.broadcast %56 : vector<8x1xf32> to vector<8x8xf32>
    %58 = arith.subf %54, %57 : vector<8x8xf32>
    %59 = math.exp %58 : vector<8x8xf32>
    %cst_23 = arith.constant dense<0.000000e+00> : vector<8xf32>
    %60 = vector.multi_reduction <add>, %59, %cst_23 [1] : vector<8x8xf32> to vector<8xf32>
    %61 = vector.shape_cast %60 : vector<8xf32> to vector<8x1xf32>
    %cst_24 = arith.constant dense<0.000000e+00> : vector<8x8xf32>
    %62 = tpu.matmul %59, %49, %cst_24 {dimension_numbers = #tpu.dot_dimension_numbers<[1], [0], [0], [1], [0, 0, 1, 1], [], []>} : vector<8x8xf32>, vector<8x8xf32>, vector<8x8xf32> -> vector<8x8xf32>
    %63 = tpu.reciprocal %61 : vector<8x1xf32> -> vector<8x1xf32>
    %64 = vector.broadcast %63 : vector<8x1xf32> to vector<8x8xf32>
    %65 = arith.mulf %62, %64 : vector<8x8xf32>
    %66 = vector.extract_strided_slice %8 {offsets = [0, 24], sizes = [8, 8], strides = [1, 1]} : vector<8x96xf32> to vector<8x8xf32>
    %67 = vector.extract_strided_slice %8 {offsets = [0, 56], sizes = [8, 8], strides = [1, 1]} : vector<8x96xf32> to vector<8x8xf32>
    %68 = vector.extract_strided_slice %8 {offsets = [0, 88], sizes = [8, 8], strides = [1, 1]} : vector<8x96xf32> to vector<8x8xf32>
    %cst_25 = arith.constant dense<0.000000e+00> : vector<8x8xf32>
    %69 = tpu.matmul %66, %67, %cst_25 {dimension_numbers = #tpu.dot_dimension_numbers<[1], [1], [0], [0], [0, 0, 1, 0], [], []>} : vector<8x8xf32>, vector<8x8xf32>, vector<8x8xf32> -> vector<8x8xf32>
    %cst_26 = arith.constant 0.353553385 : f32
    %70 = vector.broadcast %cst_26 : f32 to vector<8x8xf32>
    %71 = arith.mulf %69, %70 : vector<8x8xf32>
    %72 = vector.broadcast %3 : vector<1x8xf32> to vector<8x8xf32>
    %73 = arith.addf %71, %72 : vector<8x8xf32>
    %cst_27 = arith.constant dense<0xFF800000> : vector<8xf32>
    %74 = vector.multi_reduction <maximumf>, %73, %cst_27 [1] : vector<8x8xf32> to vector<8xf32>
    %75 = vector.shape_cast %74 : vector<8xf32> to vector<8x1xf32>
    %76 = vector.broadcast %75 : vector<8x1xf32> to vector<8x8xf32>
    %77 = arith.subf %73, %76 : vector<8x8xf32>
    %78 = math.exp %77 : vector<8x8xf32>
    %cst_28 = arith.constant dense<0.000000e+00> : vector<8xf32>
    %79 = vector.multi_reduction <add>, %78, %cst_28 [1] : vector<8x8xf32> to vector<8xf32>
    %80 = vector.shape_cast %79 : vector<8xf32> to vector<8x1xf32>
    %cst_29 = arith.constant dense<0.000000e+00> : vector<8x8xf32>
    %81 = tpu.matmul %78, %68, %cst_29 {dimension_numbers = #tpu.dot_dimension_numbers<[1], [0], [0], [1], [0, 0, 1, 1], [], []>} : vector<8x8xf32>, vector<8x8xf32>, vector<8x8xf32> -> vector<8x8xf32>
    %82 = tpu.reciprocal %80 : vector<8x1xf32> -> vector<8x1xf32>
    %83 = vector.broadcast %82 : vector<8x1xf32> to vector<8x8xf32>
    %84 = arith.mulf %81, %83 : vector<8x8xf32>
    %85 = tpu.concatenate %27, %46, %65, %84 in 1 : vector<8x8xf32>, vector<8x8xf32>, vector<8x8xf32>, vector<8x8xf32> -> vector<8x32xf32>
    %c0_30 = arith.constant 0 : index
    %c0_31 = arith.constant 0 : index
    %86 = vector.load %arg5[%c0_30, %c0_31] : memref<32x32xf32, #tpu.memory_space<vmem>>, vector<32x32xf32>
    %cst_32 = arith.constant dense<0.000000e+00> : vector<8x32xf32>
    %87 = tpu.matmul %85, %86, %cst_32 {dimension_numbers = #tpu.dot_dimension_numbers<[1], [0], [0], [1], [0, 0, 1, 1], [], []>} : vector<8x32xf32>, vector<32x32xf32>, vector<8x32xf32> -> vector<8x32xf32>
    %c0_33 = arith.constant 0 : index
    %c0_34 = arith.constant 0 : index
    %88 = vector.load %arg6[%c0_33, %c0_34] : memref<1x32xf32, #tpu.memory_space<vmem>>, vector<1x32xf32>
    %89 = vector.broadcast %88 : vector<1x32xf32> to vector<8x32xf32>
    %90 = arith.addf %87, %89 : vector<8x32xf32>
    %91 = arith.addf %90, %1 : vector<8x32xf32>
    %c0_35 = arith.constant 0 : index
    %c0_36 = arith.constant 0 : index
    %92 = vector.load %arg7[%c0_35, %c0_36] : memref<1x32xf32, #tpu.memory_space<vmem>>, vector<1x32xf32>
    %c0_37 = arith.constant 0 : index
    %c0_38 = arith.constant 0 : index
    %93 = vector.load %arg8[%c0_37, %c0_38] : memref<1x32xf32, #tpu.memory_space<vmem>>, vector<1x32xf32>
    %cst_39 = arith.constant dense<0.000000e+00> : vector<8xf32>
    %94 = vector.multi_reduction <add>, %91, %cst_39 [1] : vector<8x32xf32> to vector<8xf32>
    %95 = vector.shape_cast %94 : vector<8xf32> to vector<8x1xf32>
    %cst_40 = arith.constant 3.200000e+01 : f32
    %96 = vector.broadcast %cst_40 : f32 to vector<8x1xf32>
    %97 = arith.divf %95, %96 : vector<8x1xf32>
    %98 = vector.broadcast %97 : vector<8x1xf32> to vector<8x32xf32>
    %99 = arith.subf %91, %98 : vector<8x32xf32>
    %100 = arith.mulf %99, %99 : vector<8x32xf32>
    %cst_41 = arith.constant dense<0.000000e+00> : vector<8xf32>
    %101 = vector.multi_reduction <add>, %100, %cst_41 [1] : vector<8x32xf32> to vector<8xf32>
    %102 = vector.shape_cast %101 : vector<8xf32> to vector<8x1xf32>
    %cst_42 = arith.constant 3.200000e+01 : f32
    %103 = vector.broadcast %cst_42 : f32 to vector<8x1xf32>
    %104 = arith.divf %102, %103 : vector<8x1xf32>
    %cst_43 = arith.constant 9.99999996E-13 : f32
    %105 = vector.broadcast %cst_43 : f32 to vector<8x1xf32>
    %106 = arith.addf %104, %105 : vector<8x1xf32>
    %107 = math.rsqrt %106 : vector<8x1xf32>
    %108 = vector.broadcast %107 : vector<8x1xf32> to vector<8x32xf32>
    %109 = arith.mulf %99, %108 : vector<8x32xf32>
    %110 = vector.broadcast %92 : vector<1x32xf32> to vector<8x32xf32>
    %111 = arith.mulf %109, %110 : vector<8x32xf32>
    %112 = vector.broadcast %93 : vector<1x32xf32> to vector<8x32xf32>
    %113 = arith.addf %111, %112 : vector<8x32xf32>
    %c0_44 = arith.constant 0 : index
    %c0_45 = arith.constant 0 : index
    %c0_46 = arith.constant 0 : index
    %114 = vector.load %arg9[%c0_44, %c0_45, %c0_46] : memref<1x8x32xf32, #tpu.memory_space<vmem>>, vector<1x8x32xf32>
    %115 = vector.shape_cast %114 : vector<1x8x32xf32> to vector<8x32xf32>
    %116 = vector.shape_cast %113 : vector<8x32xf32> to vector<1x8x32xf32>
    tpu.vector_store %arg9[%c0_44, %c0_45, %c0_46], %116 {strides = array<i32>} : memref<1x8x32xf32, #tpu.memory_space<vmem>>, vector<1x8x32xf32>,
    return
  }
  func.func @transform_0(%arg0: i32) -> (i32, i32, i32) {
    %c0_i32 = arith.constant 0 : i32
    %c0_i32_0 = arith.constant 0 : i32
    %c0_i32_1 = arith.constant 0 : i32
    return %arg0, %c0_i32, %c0_i32_0 : i32, i32, i32
  }
  func.func @transform_1(%arg0: i32) -> (i32, i32, i32, i32) {
    %c0_i32 = arith.constant 0 : i32
    %c0_i32_0 = arith.constant 0 : i32
    %c0_i32_1 = arith.constant 0 : i32
    %c0_i32_2 = arith.constant 0 : i32
    return %arg0, %c0_i32, %c0_i32_0, %c0_i32_1 : i32, i32, i32, i32
  }
  func.func @transform_2(%arg0: i32) -> (i32, i32) {
    %c0_i32 = arith.constant 0 : i32
    %c0_i32_0 = arith.constant 0 : i32
    %c0_i32_1 = arith.constant 0 : i32
    return %c0_i32, %c0_i32_0 : i32, i32
  }
  func.func @transform_3(%arg0: i32) -> (i32, i32) {
    %c0_i32 = arith.constant 0 : i32
    %c0_i32_0 = arith.constant 0 : i32
    %c0_i32_1 = arith.constant 0 : i32
    return %c0_i32, %c0_i32_0 : i32, i32
  }
  func.func @transform_4(%arg0: i32) -> (i32, i32) {
    %c0_i32 = arith.constant 0 : i32
    %c0_i32_0 = arith.constant 0 : i32
    %c0_i32_1 = arith.constant 0 : i32
    return %c0_i32, %c0_i32_0 : i32, i32
  }
  func.func @transform_5(%arg0: i32) -> (i32, i32) {
    %c0_i32 = arith.constant 0 : i32
    %c0_i32_0 = arith.constant 0 : i32
    %c0_i32_1 = arith.constant 0 : i32
    return %c0_i32, %c0_i32_0 : i32, i32
  }
  func.func @transform_6(%arg0: i32) -> (i32, i32) {
    %c0_i32 = arith.constant 0 : i32
    %c0_i32_0 = arith.constant 0 : i32
    %c0_i32_1 = arith.constant 0 : i32
    return %c0_i32, %c0_i32_0 : i32, i32
  }
  func.func @transform_7(%arg0: i32) -> (i32, i32) {
    %c0_i32 = arith.constant 0 : i32
    %c0_i32_0 = arith.constant 0 : i32
    %c0_i32_1 = arith.constant 0 : i32
    return %c0_i32, %c0_i32_0 : i32, i32
  }
  func.func @transform_8(%arg0: i32) -> (i32, i32, i32) {
    %c0_i32 = arith.constant 0 : i32
    %c0_i32_0 = arith.constant 0 : i32
    %c0_i32_1 = arith.constant 0 : i32
    return %arg0, %c0_i32, %c0_i32_0 : i32, i32, i32
  }
}

module attributes {stable_mosaic.version = 11 : i64} {
  func.func @_mlp_block_kernel(%arg0: i32, %arg1: memref<16x32xf32, #tpu.memory_space<vmem>>, %arg2: memref<32x128xf32, #tpu.memory_space<vmem>>, %arg3: memref<1x128xf32, #tpu.memory_space<vmem>>, %arg4: memref<128x32xf32, #tpu.memory_space<vmem>>, %arg5: memref<1x32xf32, #tpu.memory_space<vmem>>, %arg6: memref<1x32xf32, #tpu.memory_space<vmem>>, %arg7: memref<1x32xf32, #tpu.memory_space<vmem>>, %arg8: memref<16x32xf32, #tpu.memory_space<vmem>>) attributes {dimension_semantics = [#tpu.dimension_semantics<parallel>], iteration_bounds = array<i64: 1>, scalar_prefetch = 0 : i64, scratch_operands = 0 : i64, tpu.core_type = #tpu.core_type<tc>, window_params = [{transform_indices = @transform_0, window_bounds = array<i64: 16, 32>}, {pipeline_mode = #tpu.pipeline_mode<synchronous>, transform_indices = @transform_1, window_bounds = array<i64: 32, 128>}, {pipeline_mode = #tpu.pipeline_mode<synchronous>, transform_indices = @transform_2, window_bounds = array<i64: 1, 128>}, {pipeline_mode = #tpu.pipeline_mode<synchronous>, transform_indices = @transform_3, window_bounds = array<i64: 128, 32>}, {pipeline_mode = #tpu.pipeline_mode<synchronous>, transform_indices = @transform_4, window_bounds = array<i64: 1, 32>}, {pipeline_mode = #tpu.pipeline_mode<synchronous>, transform_indices = @transform_5, window_bounds = array<i64: 1, 32>}, {pipeline_mode = #tpu.pipeline_mode<synchronous>, transform_indices = @transform_6, window_bounds = array<i64: 1, 32>}, {transform_indices = @transform_7, window_bounds = array<i64: 16, 32>}]} {
    %c0 = arith.constant 0 : index
    %c0_0 = arith.constant 0 : index
    %0 = vector.load %arg1[%c0, %c0_0] : memref<16x32xf32, #tpu.memory_space<vmem>>, vector<16x32xf32>
    %c0_1 = arith.constant 0 : index
    %c0_2 = arith.constant 0 : index
    %1 = vector.load %arg2[%c0_1, %c0_2] : memref<32x128xf32, #tpu.memory_space<vmem>>, vector<32x128xf32>
    %cst = arith.constant dense<0.000000e+00> : vector<16x128xf32>
    %2 = tpu.matmul %0, %1, %cst {dimension_numbers = #tpu.dot_dimension_numbers<[1], [0], [0], [1], [0, 0, 1, 1], [], []>} : vector<16x32xf32>, vector<32x128xf32>, vector<16x128xf32> -> vector<16x128xf32>
    %c0_3 = arith.constant 0 : index
    %c0_4 = arith.constant 0 : index
    %3 = vector.load %arg3[%c0_3, %c0_4] : memref<1x128xf32, #tpu.memory_space<vmem>>, vector<1x128xf32>
    %4 = vector.broadcast %3 : vector<1x128xf32> to vector<16x128xf32>
    %5 = arith.addf %2, %4 : vector<16x128xf32>
    %cst_5 = arith.constant 5.000000e-01 : f32
    %6 = vector.broadcast %cst_5 : f32 to vector<16x128xf32>
    %7 = arith.mulf %5, %6 : vector<16x128xf32>
    %cst_6 = arith.constant 0.707106769 : f32
    %8 = vector.broadcast %cst_6 : f32 to vector<16x128xf32>
    %9 = arith.mulf %5, %8 : vector<16x128xf32>
    %10 = math.absf %9 : vector<16x128xf32>
    %cst_7 = arith.constant 0.327591091 : f32
    %11 = vector.broadcast %cst_7 : f32 to vector<16x128xf32>
    %12 = arith.mulf %11, %10 : vector<16x128xf32>
    %cst_8 = arith.constant 1.000000e+00 : f32
    %13 = vector.broadcast %cst_8 : f32 to vector<16x128xf32>
    %14 = arith.addf %13, %12 : vector<16x128xf32>
    %cst_9 = arith.constant 1.000000e+00 : f32
    %15 = vector.broadcast %cst_9 : f32 to vector<16x128xf32>
    %16 = arith.divf %15, %14 : vector<16x128xf32>
    %cst_10 = arith.constant 1.06140542 : f32
    %17 = vector.broadcast %cst_10 : f32 to vector<16x128xf32>
    %18 = arith.mulf %17, %16 : vector<16x128xf32>
    %cst_11 = arith.constant 1.45315206 : f32
    %19 = vector.broadcast %cst_11 : f32 to vector<16x128xf32>
    %20 = arith.subf %18, %19 : vector<16x128xf32>
    %21 = arith.mulf %20, %16 : vector<16x128xf32>
    %cst_12 = arith.constant 1.42141378 : f32
    %22 = vector.broadcast %cst_12 : f32 to vector<16x128xf32>
    %23 = arith.addf %21, %22 : vector<16x128xf32>
    %24 = arith.mulf %23, %16 : vector<16x128xf32>
    %cst_13 = arith.constant 0.284496725 : f32
    %25 = vector.broadcast %cst_13 : f32 to vector<16x128xf32>
    %26 = arith.subf %24, %25 : vector<16x128xf32>
    %27 = arith.mulf %26, %16 : vector<16x128xf32>
    %cst_14 = arith.constant 0.254829586 : f32
    %28 = vector.broadcast %cst_14 : f32 to vector<16x128xf32>
    %29 = arith.addf %27, %28 : vector<16x128xf32>
    %30 = arith.mulf %29, %16 : vector<16x128xf32>
    %cst_15 = arith.constant 0.000000e+00 : f32
    %31 = vector.broadcast %cst_15 : f32 to vector<16x128xf32>
    %32 = arith.subf %31, %10 : vector<16x128xf32>
    %33 = arith.mulf %32, %10 : vector<16x128xf32>
    %34 = math.exp %33 : vector<16x128xf32>
    %35 = arith.mulf %30, %34 : vector<16x128xf32>
    %cst_16 = arith.constant 1.000000e+00 : f32
    %36 = vector.broadcast %cst_16 : f32 to vector<16x128xf32>
    %37 = arith.subf %36, %35 : vector<16x128xf32>
    %cst_17 = arith.constant 0.000000e+00 : f32
    %38 = vector.broadcast %cst_17 : f32 to vector<16x128xf32>
    %39 = arith.cmpf olt, %9, %38 : vector<16x128xf32>
    %cst_18 = arith.constant 0.000000e+00 : f32
    %40 = vector.broadcast %cst_18 : f32 to vector<16x128xf32>
    %41 = arith.subf %40, %37 : vector<16x128xf32>
    %42 = arith.select %39, %41, %37 : vector<16x128xi1>, vector<16x128xf32>
    %cst_19 = arith.constant 1.000000e+00 : f32
    %43 = vector.broadcast %cst_19 : f32 to vector<16x128xf32>
    %44 = arith.addf %43, %42 : vector<16x128xf32>
    %45 = arith.mulf %7, %44 : vector<16x128xf32>
    %c0_20 = arith.constant 0 : index
    %c0_21 = arith.constant 0 : index
    %46 = vector.load %arg4[%c0_20, %c0_21] : memref<128x32xf32, #tpu.memory_space<vmem>>, vector<128x32xf32>
    %cst_22 = arith.constant dense<0.000000e+00> : vector<16x32xf32>
    %47 = tpu.matmul %45, %46, %cst_22 {dimension_numbers = #tpu.dot_dimension_numbers<[1], [0], [0], [1], [0, 0, 1, 1], [], []>} : vector<16x128xf32>, vector<128x32xf32>, vector<16x32xf32> -> vector<16x32xf32>
    %c0_23 = arith.constant 0 : index
    %c0_24 = arith.constant 0 : index
    %48 = vector.load %arg5[%c0_23, %c0_24] : memref<1x32xf32, #tpu.memory_space<vmem>>, vector<1x32xf32>
    %49 = vector.broadcast %48 : vector<1x32xf32> to vector<16x32xf32>
    %50 = arith.addf %47, %49 : vector<16x32xf32>
    %51 = arith.addf %50, %0 : vector<16x32xf32>
    %c0_25 = arith.constant 0 : index
    %c0_26 = arith.constant 0 : index
    %52 = vector.load %arg6[%c0_25, %c0_26] : memref<1x32xf32, #tpu.memory_space<vmem>>, vector<1x32xf32>
    %c0_27 = arith.constant 0 : index
    %c0_28 = arith.constant 0 : index
    %53 = vector.load %arg7[%c0_27, %c0_28] : memref<1x32xf32, #tpu.memory_space<vmem>>, vector<1x32xf32>
    %cst_29 = arith.constant dense<0.000000e+00> : vector<16xf32>
    %54 = vector.multi_reduction <add>, %51, %cst_29 [1] : vector<16x32xf32> to vector<16xf32>
    %55 = vector.shape_cast %54 : vector<16xf32> to vector<16x1xf32>
    %cst_30 = arith.constant 3.200000e+01 : f32
    %56 = vector.broadcast %cst_30 : f32 to vector<16x1xf32>
    %57 = arith.divf %55, %56 : vector<16x1xf32>
    %58 = vector.broadcast %57 : vector<16x1xf32> to vector<16x32xf32>
    %59 = arith.subf %51, %58 : vector<16x32xf32>
    %60 = arith.mulf %59, %59 : vector<16x32xf32>
    %cst_31 = arith.constant dense<0.000000e+00> : vector<16xf32>
    %61 = vector.multi_reduction <add>, %60, %cst_31 [1] : vector<16x32xf32> to vector<16xf32>
    %62 = vector.shape_cast %61 : vector<16xf32> to vector<16x1xf32>
    %cst_32 = arith.constant 3.200000e+01 : f32
    %63 = vector.broadcast %cst_32 : f32 to vector<16x1xf32>
    %64 = arith.divf %62, %63 : vector<16x1xf32>
    %cst_33 = arith.constant 9.99999996E-13 : f32
    %65 = vector.broadcast %cst_33 : f32 to vector<16x1xf32>
    %66 = arith.addf %64, %65 : vector<16x1xf32>
    %67 = math.rsqrt %66 : vector<16x1xf32>
    %68 = vector.broadcast %67 : vector<16x1xf32> to vector<16x32xf32>
    %69 = arith.mulf %59, %68 : vector<16x32xf32>
    %70 = vector.broadcast %52 : vector<1x32xf32> to vector<16x32xf32>
    %71 = arith.mulf %69, %70 : vector<16x32xf32>
    %72 = vector.broadcast %53 : vector<1x32xf32> to vector<16x32xf32>
    %73 = arith.addf %71, %72 : vector<16x32xf32>
    %c0_34 = arith.constant 0 : index
    %c0_35 = arith.constant 0 : index
    %74 = vector.load %arg8[%c0_34, %c0_35] : memref<16x32xf32, #tpu.memory_space<vmem>>, vector<16x32xf32>
    tpu.vector_store %arg8[%c0_34, %c0_35], %73 {strides = array<i32>} : memref<16x32xf32, #tpu.memory_space<vmem>>, vector<16x32xf32>,
    return
  }
  func.func @transform_0(%arg0: i32) -> (i32, i32) {
    %c0_i32 = arith.constant 0 : i32
    %c0_i32_0 = arith.constant 0 : i32
    return %arg0, %c0_i32 : i32, i32
  }
  func.func @transform_1(%arg0: i32) -> (i32, i32) {
    %c0_i32 = arith.constant 0 : i32
    %c0_i32_0 = arith.constant 0 : i32
    %c0_i32_1 = arith.constant 0 : i32
    return %c0_i32, %c0_i32_0 : i32, i32
  }
  func.func @transform_2(%arg0: i32) -> (i32, i32) {
    %c0_i32 = arith.constant 0 : i32
    %c0_i32_0 = arith.constant 0 : i32
    %c0_i32_1 = arith.constant 0 : i32
    return %c0_i32, %c0_i32_0 : i32, i32
  }
  func.func @transform_3(%arg0: i32) -> (i32, i32) {
    %c0_i32 = arith.constant 0 : i32
    %c0_i32_0 = arith.constant 0 : i32
    %c0_i32_1 = arith.constant 0 : i32
    return %c0_i32, %c0_i32_0 : i32, i32
  }
  func.func @transform_4(%arg0: i32) -> (i32, i32) {
    %c0_i32 = arith.constant 0 : i32
    %c0_i32_0 = arith.constant 0 : i32
    %c0_i32_1 = arith.constant 0 : i32
    return %c0_i32, %c0_i32_0 : i32, i32
  }
  func.func @transform_5(%arg0: i32) -> (i32, i32) {
    %c0_i32 = arith.constant 0 : i32
    %c0_i32_0 = arith.constant 0 : i32
    %c0_i32_1 = arith.constant 0 : i32
    return %c0_i32, %c0_i32_0 : i32, i32
  }
  func.func @transform_6(%arg0: i32) -> (i32, i32) {
    %c0_i32 = arith.constant 0 : i32
    %c0_i32_0 = arith.constant 0 : i32
    %c0_i32_1 = arith.constant 0 : i32
    return %c0_i32, %c0_i32_0 : i32, i32
  }
  func.func @transform_7(%arg0: i32) -> (i32, i32) {
    %c0_i32 = arith.constant 0 : i32
    %c0_i32_0 = arith.constant 0 : i32
    return %arg0, %c0_i32 : i32, i32
  }
}

</mosaic_0001>

<bundles_post_ra>
// kernel: bert_encoder_forward.5
= control target key start
LH: loop header
LB: loop body
LE: loop exit
PB: predicated region body
PF: predicated region fallthrough
CT: control target
= control target key end

     0   :  { %vm39_vm0 = vcmask 261120   ;;  %s558_s1 = inlined_call_operand.vmem [shape: f32[32,128], index: 1, kind: input, shape index: {}]   ;;  %s559_s0 = inlined_call_operand.vmem [shape: f32[16,32], index: 0, kind: input, shape index: {}]   ;;  %s560_s3 = inlined_call_operand.vmem [shape: f32[128,32], index: 3, kind: input, shape index: {}]   ;;  %s561_s2 = inlined_call_operand.vmem [shape: f32[1,128], index: 2, kind: input, shape index: {}]   ;;  %s562_s4 = inlined_call_operand.vmem [shape: f32[1,32], index: 4, kind: input, shape index: {}]   ;;  %s563_s5 = inlined_call_operand.vmem [shape: f32[1,32], index: 5, kind: input, shape index: {}]   ;;  %s564_s6 = inlined_call_operand.vmem [shape: f32[1,32], index: 6, kind: input, shape index: {}]   ;;  %s565_s7 = inlined_call_operand.vmem [shape: f32[16,32], index: 7, kind: output, shape index: {}]  }
   0x1   :  { %v31_v0 = vld [vmem:[%s558_s1 + $0x18] sm:$0xff]  ;;  %v30_v1 = vld [vmem:[%s558_s1 + $0x10] sm:$0xff]  ;;  %v467_v2 = vld [vmem:[%s559_s0] sm:$0xff] }
   0x2   :  { %360 = vmatprep.subr.mxu0 %v31_v0  ;;  %v29_v3 = vld [vmem:[%s558_s1 + $0x8] sm:$0xff]  ;;  %368 = vmatprep.mubr.msk.f32.mxu0 %vm39_vm0, %v467_v2  ;;  %v28_v4 = vld [vmem:[%s558_s1] sm:$0xff]  ;;  %v190_v6 = vld [vmem:[%s560_s3 + $0x78] sm:$0xff] }
   0x3   :  { %361 = vmatpush3.msra.mxu0 %v31_v0  ;;  %v480_v5 = vld [vmem:[%s559_s0 + $0x8] sm:$0xff]  ;;  %v189_v7 = vld [vmem:[%s560_s3 + $0x70] sm:$0xff]  ;;  %371 = vmatprep.subr.mxu1 %v190_v6  ;;  %v187_v9 = vld [vmem:[%s560_s3 + $0x60] sm:$0xff] }
   0x4   :  { %362 = vmatprep.subr.mxu0 %v30_v1  ;;  %372 = vmatpush3.msra.mxu1 %v190_v6  ;;  %v188_v8 = vld [vmem:[%s560_s3 + $0x68] sm:$0xff]  ;;  %v186_v10 = vld [vmem:[%s560_s3 + $0x58] sm:$0xff]  ;;  %v185_v11 = vld [vmem:[%s560_s3 + $0x50] sm:$0xff] }
   0x5   :  { %363 = vmatpush3.msra.mxu0 %v30_v1  ;;  %373 = vmatprep.subr.mxu1 %v189_v7  ;;  %v184_v12 = vld [vmem:[%s560_s3 + $0x48] sm:$0xff]  ;;  %v183_v13 = vld [vmem:[%s560_s3 + $0x40] sm:$0xff]  ;;  %v182_v14 = vld [vmem:[%s560_s3 + $0x38] sm:$0xff] }
   0x6   :  { %364 = vmatprep.subr.mxu0 %v29_v3  ;;  %374 = vmatpush3.msra.mxu1 %v189_v7  ;;  %v181_v15 = vld [vmem:[%s560_s3 + $0x30] sm:$0xff]  ;;  %v180_v16 = vld [vmem:[%s560_s3 + $0x28] sm:$0xff]  ;;  %v179_v17 = vld [vmem:[%s560_s3 + $0x20] sm:$0xff] }
   0x7   :  { %365 = vmatpush3.msra.mxu0 %v29_v3  ;;  %375 = vmatprep.subr.mxu1 %v188_v8  ;;  %v178_v18 = vld [vmem:[%s560_s3 + $0x18] sm:$0xff]  ;;  %v177_v19 = vld [vmem:[%s560_s3 + $0x10] sm:$0xff]  ;;  %v176_v20 = vld [vmem:[%s560_s3 + $0x8] sm:$0xff] }
   0x8   :  { %366 = vmatprep.subr.mxu0 %v28_v4  ;;  %376 = vmatpush3.msra.mxu1 %v188_v8  ;;  %v175_v21 = vld [vmem:[%s560_s3] sm:$0xff] }
   0x9   :  { %367 = vmatpush3.msra.mxu0 %v28_v4  ;;  %377 = vmatprep.subr.mxu1 %v187_v9  ;;  %v326_v22 = vld [vmem:[%s561_s2] ss:$0 sm:$0xff] }
   0xa   :  { %369 = vmatmul.mubr.msk.f32.vlgmr.msra.gmra.mxu0 %vm39_vm0, %v480_v5  ;;  %378 = vmatpush3.msra.mxu1 %v187_v9 }
   0xb   :  { %379 = vmatprep.subr.mxu1 %v186_v10 }
   0xc   :  { %380 = vmatpush3.msra.mxu1 %v186_v10 }
   0xd   :  { %381 = vmatprep.subr.mxu1 %v185_v11 }
   0xe   :  { %382 = vmatpush3.msra.mxu1 %v185_v11 }
   0xf   :  { %383 = vmatprep.subr.mxu1 %v184_v12 }
  0x10   :  { %384 = vmatpush3.msra.mxu1 %v184_v12 }
  0x11   :  { %385 = vmatprep.subr.mxu1 %v183_v13 }
  0x12   :  { %386 = vmatpush3.msra.mxu1 %v183_v13 }
  0x13   :  { %387 = vmatprep.subr.mxu1 %v182_v14 }
  0x14   :  { %388 = vmatpush3.msra.mxu1 %v182_v14 }
  0x15   :  { %389 = vmatprep.subr.mxu1 %v181_v15 }
  0x16   :  { %390 = vmatpush3.msra.mxu1 %v181_v15 }
  0x17   :  { %391 = vmatprep.subr.mxu1 %v180_v16 }
  0x18   :  { %392 = vmatpush3.msra.mxu1 %v180_v16  ;;  %v333_v16 = vld [vmem:[%s562_s4] ss:$0 sm:$0xff] }
  0x19   :  { %393 = vmatprep.subr.mxu1 %v179_v17 }
  0x1a   :  { %394 = vmatpush3.msra.mxu1 %v179_v17 }
  0x1b   :  { %395 = vmatprep.subr.mxu1 %v178_v18 }
  0x1c   :  { %396 = vmatpush3.msra.mxu1 %v178_v18 }
  0x1d   :  { %397 = vmatprep.subr.mxu1 %v177_v19 }
  0x1e   :  { %398 = vmatpush3.msra.mxu1 %v177_v19 }
  0x1f   :  { %399 = vmatprep.subr.mxu1 %v176_v20 }
  0x20   :  { %400 = vmatpush3.msra.mxu1 %v176_v20 }
  0x21   :  { %401 = vmatprep.subr.mxu1 %v175_v21 }
  0x22   :  { %402 = vmatpush3.msra.mxu1 %v175_v21 }
  0xca   :  { %v370_v23 = vpop.f32.mrf.mxu0 }
  0xcb   :  { %v118_v24 = vadd.f32 %v370_v23, %v326_v22 }
  0xcc   :  { %v112_v25 = vpop.f32.mrf.mxu0 }
  0xcd   :  { %v124_v26 = vmul.f32 0.70710677, %v118_v24  ;;  %v113_v27 = vadd.f32 %v326_v22, %v112_v25  ;;  %v122_v12 = vmul.f32 0.5, %v118_v24 }
  0xcf   :  { %v126_v28 = vand.u32 2147483647, %v124_v26  ;;  %v123_v29 = vmul.f32 0.70710677, %v113_v27  ;;  %vm166_vm1 = vcmp.lt.f32.partialorder %v124_v26, 0.0  ;;  %v121_v10 = vmul.f32 0.5, %v113_v27 }
  0xd1   :  { %v128_v30 = vmul.f32 0.3275911, %v126_v28  ;;  %v125_v31 = vand.u32 2147483647, %v123_v29  ;;  %v154_v35 = vsub.f32 0.0, %v126_v28  ;;  %vm165_vm2 = vcmp.lt.f32.partialorder %v123_v29, 0.0 }
  0xd3   :  { %v130_v32 = vadd.f32 1.0, %v128_v30  ;;  %v127_v33 = vmul.f32 0.3275911, %v125_v31  ;;  %v153_v36 = vsub.f32 0.0, %v125_v31  ;;  %v156_v37 = vmul.f32 %v154_v35, %v126_v28 }
  0xd5   :  { %406 = vrcp.f32 %v130_v32  ;;  %v129_v34 = vadd.f32 1.0, %v127_v33  ;;  %v155_v39 = vmul.f32 %v153_v36, %v125_v31  ;;  %v159_v40 = vmul.f32 1.442695, %v156_v37 }
  0xd7   :  { %408 = vrcp.f32 %v129_v34  ;;  %v157_v44 = vmul.f32 1.442695, %v155_v39  ;;  %v334_v39 = vld [vmem:[%s563_s5] ss:$0 sm:$0xff] }
  0xd8   :  { %410 = vpow2.f32 %v159_v40 }
  0xd9   :  { %412 = vpow2.f32 %v157_v44 }
  0xe2   :  { %v407_v38 = vpop.eup %406 }
  0xe3   :  { %v136_v41 = vmul.f32 1.0614054, %v407_v38 }
  0xe4   :  { %v409_v42 = vpop.eup %408 }
  0xe5   :  { %v330_v43 = vadd.f32 -1.4531521, %v136_v41  ;;  %v135_v45 = vmul.f32 1.0614054, %v409_v42  ;;  %v411_v59 = vpop.eup %410  ;;  %v335_v41 = vld [vmem:[%s564_s6] ss:$0 sm:$0xff] }
  0xe6   :  { %v413_v63 = vpop.eup %412 }
  0xe7   :  { %v140_v46 = vmul.f32 %v407_v38, %v330_v43  ;;  %v329_v47 = vadd.f32 -1.4531521, %v135_v45 }
  0xe9   :  { %v142_v48 = vadd.f32 1.4214138, %v140_v46  ;;  %v139_v49 = vmul.f32 %v409_v42, %v329_v47 }
  0xeb   :  { %v144_v50 = vmul.f32 %v407_v38, %v142_v48  ;;  %v141_v51 = vadd.f32 1.4214138, %v139_v49 }
  0xed   :  { %v332_v52 = vadd.f32 -0.28449672, %v144_v50  ;;  %v143_v53 = vmul.f32 %v409_v42, %v141_v51 }
  0xef   :  { %v148_v54 = vmul.f32 %v407_v38, %v332_v52  ;;  %v331_v55 = vadd.f32 -0.28449672, %v143_v53 }
  0xf1   :  { %v150_v56 = vadd.f32 0.2548296, %v148_v54  ;;  %v147_v57 = vmul.f32 %v409_v42, %v331_v55 }
  0xf3   :  { %v152_v58 = vmul.f32 %v407_v38, %v150_v56  ;;  %v149_v60 = vadd.f32 0.2548296, %v147_v57 }
  0xf5   :  { %v162_v61 = vmul.f32 %v411_v59, %v152_v58  ;;  %v151_v62 = vmul.f32 %v409_v42, %v149_v60 }
  0xf7   :  { %v164_v0 = vsub.f32 1.0, %v162_v61  ;;  %v161_v1 = vmul.f32 %v413_v63, %v151_v62 }
  0xf9   :  { %v168_v3 = vsub.f32 0.0, %v164_v0  ;;  %v163_v4 = vsub.f32 1.0, %v161_v1 }
  0xfb   :  { %v170_v6 = vsel %vm166_vm1, %v168_v3, %v164_v0  ;;  %v167_v7 = vsub.f32 0.0, %v163_v4 }
  0xfc   :  { %v172_v9 = vadd.f32 1.0, %v170_v6 }
  0xfd   :  { %v169_v8 = vsel %vm165_vm2, %v167_v7, %v163_v4 }
  0xfe   :  { %v171_v11 = vadd.f32 1.0, %v169_v8  ;;  %v174_v14 = vmul.f32 %v172_v9, %v122_v12 }
 0x100   :  { %v173_v13 = vmul.f32 %v171_v11, %v121_v10 }
 0x102   :  { %403 = vmatprep.mubr.f32.mxu1 %v173_v13 }
 0x103   :  { %404 = vmatmul.mubr.f32.vlgmr.msra.gmra.mxu1 %v174_v14 }
 0x1c3   :  { %v405_v15 = vpop.f32.mrf.mxu1 }
 0x1c4   :  { %v270_v18 = vadd.f32 %v405_v15, %v333_v16 }
 0x1c5   :  { %v264_v17 = vpop.f32.mrf.mxu1 }
 0x1c6   :  { %v265_v19 = vadd.f32 %v333_v16, %v264_v17  ;;  %v274_v22 = vadd.f32 %v270_v18, %v480_v5 }
 0x1c8   :  { %v273_v20 = vadd.f32 %v265_v19, %v467_v2  ;;  %v280_v23 = vsel %vm39_vm0, %v274_v22, 0.0 }
 0x1ca   :  { %v277_v21 = vsel %vm39_vm0, %v273_v20, 0.0 }
 0x1cb   :  { %278 = vadd.xlane.f32.xlu0 %v277_v21 }
 0x1cf   :  { %281 = vadd.xlane.f32.xlu0 %v280_v23 }
 0x254   :  { %v279_v24 = vpop.xlane.xlu0 %278 }
 0x255   :  { %v284_v25 = vmul.f32 0.03125, %v279_v24 }
 0x257   :  { %v286_v26 = vsub.f32 %v273_v20, %v284_v25 }
 0x258   :  { %v282_v27 = vpop.xlane.xlu0 %281 }
 0x259   :  { %v285_v28 = vmul.f32 0.03125, %v282_v27  ;;  %v288_v29 = vmul.f32 %v286_v26, %v286_v26 }
 0x25b   :  { %v287_v30 = vsub.f32 %v274_v22, %v285_v28  ;;  %v290_v31 = vsel %vm39_vm0, %v288_v29, 0.0 }
 0x25c   :  { %291 = vadd.xlane.f32.xlu1 %v290_v31 }
 0x25d   :  { %v289_v32 = vmul.f32 %v287_v30, %v287_v30 }
 0x25f   :  { %v293_v2 = vsel %vm39_vm0, %v289_v32, 0.0 }
 0x260   :  { %294 = vadd.xlane.f32.xlu1 %v293_v2 }
 0x2e5   :  { %v292_v33 = vpop.xlane.xlu1 %291 }
 0x2e6   :  { %v296_v5 = vmul.f32 0.03125, %v292_v33 }
 0x2e8   :  { %v298_v34 = vadd.f32 1e-12, %v296_v5 }
 0x2e9   :  { %v295_v35 = vpop.xlane.xlu1 %294 }
 0x2ea   :  { %414 = vrsqrt.f32 %v298_v34  ;;  %v297_v36 = vmul.f32 0.03125, %v295_v35 }
 0x2ec   :  { %v299_v37 = vadd.f32 1e-12, %v297_v36 }
 0x2ee   :  { %416 = vrsqrt.f32 %v299_v37 }
 0x2f7   :  { %v415_v38 = vpop.eup %414 }
 0x2f8   :  { %v302_v40 = vmul.f32 %v415_v38, %v286_v26 }
 0x2fa   :  { %v310_v42 = vmul.f32 %v334_v39, %v302_v40 }
 0x2fb   :  { %v417_v43 = vpop.eup %416 }
 0x2fc   :  { %v318_v44 = vadd.f32 %v335_v41, %v310_v42  ;;  %v303_v45 = vmul.f32 %v417_v43, %v287_v30 }
 0x2fe   :  { %320 = vst.msk [vmem:[%s565_s7] sm:$0xff] %vm39_vm0, %v318_v44  ;;  %v311_v46 = vmul.f32 %v334_v39, %v303_v45 }
 0x300   :  { %v319_v47 = vadd.f32 %v335_v41, %v311_v46 }
 0x302   :  { %321 = vst.msk [vmem:[%s565_s7 + $0x8] sm:$0xff] %vm39_vm0, %v319_v47 }

// kernel: bert_encoder_forward.6
= control target key start
LH: loop header
LB: loop body
LE: loop exit
PB: predicated region body
PF: predicated region fallthrough
CT: control target
= control target key end

     0   :  { %s1498_s27 = smov 0   ;;  %s1645_s0 = inlined_call_operand.vmem [shape: f32[2,8,32], index: 0, kind: input, shape index: {}]   ;;  %s1646_s1 = inlined_call_operand.vmem [shape: f32[2,1,1,8], index: 1, kind: input, shape index: {}]   ;;  %s1647_s2 = inlined_call_operand.vmem [shape: f32[32,96], index: 2, kind: input, shape index: {}]   ;;  %s1648_s3 = inlined_call_operand.vmem [shape: f32[1,96], index: 3, kind: input, shape index: {}]   ;;  %s1649_s4 = inlined_call_operand.vmem [shape: f32[32,32], index: 4, kind: input, shape index: {}]   ;;  %s1650_s5 = inlined_call_operand.vmem [shape: f32[1,32], index: 5, kind: input, shape index: {}]   ;;  %s1651_s6 = inlined_call_operand.vmem [shape: f32[1,32], index: 6, kind: input, shape index: {}]   ;;  %s1652_s7 = inlined_call_operand.vmem [shape: f32[1,32], index: 7, kind: input, shape index: {}]   ;;  %s1653_s8 = inlined_call_operand.vmem [shape: f32[2,8,32], index: 8, kind: output, shape index: {}]  }
   0x1 LB: > { %s1271_s28 = sadd.s32 4294967295, %s1435_s27   ;;  %p1275_p0 = scmp.ge.s32.totalorder %s1435_s27, 1  ;;  %s1435_s27 = sphi %s1498_s27, %s18_s27  }
   0x2   : > { %p269_p1 = scmp.lt.s32.totalorder %s1435_s27, 3 }
   0x4   : > { %p270_p2 = pnand %p1275_p0, %p269_p1 }
   0x5   : > { %p304_p3 = scmp.lt.s32.totalorder (!%p270_p2), %s1271_s28, 1  ;;  %s1439_s21 = smov (!%p270_p2), 64  }
   0x6   : > { %273 = sbr.rel (%p270_p2) target bundleno = 1870 (0x74e), region = 52  ;;  %s1440_s22 = smov (!%p270_p2), 96  }
   0x7   : > { %s1441_s23 = smov (!%p270_p2), 88   ;;  %s1442_s24 = smov (!%p270_p2), 120  }
   0x8   : > { %s1443_s25 = smov (!%p270_p2), 80   ;;  %s1444_s26 = smov (!%p270_p2), 112  }
   0x9   : > { %s1445_s29 = smov (!%p270_p2), 72   ;;  %s1446_s30 = smov (!%p270_p2), 104  }
   0xa   : > { %s1447_s12 = smov (!%p270_p2), 56   ;;  %s1448_s14 = smov (!%p270_p2), 40  }
   0xb   : > { %v320_v0 = vld [vmem:[%s1647_s2 + $0x18] sm:$0xff]  ;;  %v1437_v1 = vmov 0.0   ;;  %v319_v2 = vld [vmem:[%s1647_s2 + $0x10] sm:$0xff]  ;;  %vm1438_vm0 = vmmov 0   ;;  %s1655_s28 = smov (!%p304_p3, %s1271_s28), 1  ;;  %v318_v3 = vld [vmem:[%s1647_s2 + $0x8] sm:$0xff] }
   0xc   : > { %1325 = vmatprep.subr.mxu0 %v1437_v1  ;;  %1333 = vmatprep.mubr.msk.f32.mxu0 %vm1438_vm0, %v1437_v1  ;;  %s1276_s13 = sshll.u32 %s1655_s28, 3  ;;  %v317_v4 = vld [vmem:[%s1647_s2] sm:$0xff]  ;;  %vm328_vm1 = vcmask 261120   ;;  %vm405_vm2 = vcmask 64512   ;;  %s310_s11 = scalar_lea.vmem %s1646_s1, %s1655_s28  ;;  %vm1089_vm3 = vcmask 130048   ;;  %vm1091_vm4 = vcmask 195584  }
   0xd   : > { %1326 = vmatpush3.msra.mxu0 %v320_v0  ;;  %1336 = vmatprep.subr.mxu1 %v1437_v1  ;;  %s307_s18 = scalar_lea.vmem %s1645_s0, %s1276_s13  ;;  %v1278_v6 = vld [vmem:[%s1648_s3] ss:$0 sm:$0xff]  ;;  %s1449_s15 = smov 48  }
   0xe   : > { %1327 = vmatprep.subr.mxu0 %v1437_v1  ;;  %1338 = vmatprep.mubr.msk.f32.mxu1 %vm1438_vm0, %v1437_v1  ;;  %v1534_v5 = vld [vmem:[%s307_s18] sm:$0xff]  ;;  %s314_s16 = scalar_lea.vmem %s1653_s8, %s1276_s13 }
   0xf   : > { %1328 = vmatpush3.msra.mxu0 %v319_v2  ;;  %v1282_v19 = vld [vmem:[%s310_s11] ss:$0 sm:$0xff] }
  0x10   : > { %1329 = vmatprep.subr.mxu0 %v1437_v1 }
  0x11   : > { %1330 = vmatpush3.msra.mxu0 %v318_v3  ;;  %v1096_v3 = vld [vmem:[%s1649_s4 + $0x18] sm:$0xff] }
  0x12   : > { %1331 = vmatprep.subr.mxu0 %v1437_v1 }
  0x13   : > { %1332 = vmatpush3.msra.mxu0 %v317_v4 }
  0x14   : > { %1334 = vmatmul.mubr.msk.f32.vlgmr.msra.gmra.mxu0 %vm328_vm1, %v1534_v5  ;;  %1356 = vmatprep.subr.mxu0 %v1437_v1 }
  0x15   : > { %1358 = vmatprep.mubr.msk.f32.mxu0 %vm1438_vm0, %v1437_v1 }
  0xd4   : > { %v398_v7 = vpop.f32.mrf.mxu0 }
  0xd5   : > { %v1545_v8 = vadd.f32 %v1278_v6, %v398_v7  ;;  %v1095_v6 = vld [vmem:[%s1649_s4 + $0x10] sm:$0xff]  ;;  %v1094_v7 = vld [vmem:[%s1649_s4 + $0x8] sm:$0xff] }
  0xd6   : > { %v1335_v9 = vpop.f32.mrf.mxu0 }
  0xd7   : > { %497 = vrot.lane.b32.xlu1 %v1545_v8, %s1439_s21  ;;  %403 = vrot.lane.b32.xlu0 %v1545_v8, %s1440_s22 }
  0xdb   : > { %577 = vrot.lane.b32.xlu1 %v1545_v8, %s1441_s23 }
  0xdf   : > { %575 = vrot.lane.b32.xlu1 %v1545_v8, %s1442_s24  ;;  %s1450_s24 = smov 8  }
  0xe3   : > { %744 = vrot.lane.b32.xlu1 %v1545_v8, %s1443_s25  ;;  %s1451_s25 = smov 16  }
  0xe7   : > { %742 = vrot.lane.b32.xlu1 %v1545_v8, %s1444_s26  ;;  %s1452_s26 = smov 24  }
  0xeb   : > { %911 = vrot.lane.b32.xlu1 %v1545_v8, %s1445_s29 }
  0xef   : > { %909 = vrot.lane.b32.xlu1 %v1545_v8, %s1446_s30 }
 0x149   : > { %v498_v10 = vpop.permute.xlu1 %497  ;;  %v404_v11 = vpop.permute.xlu0 %403 }
 0x14a   : > { %1337 = vmatpush3.xpose.msk.msra.mxu1 %vm405_vm2, %v404_v11 }
 0x14b   : > { %1341 = vmatprep.subr.mxu1 %v1437_v1 }
 0x14d   : > { %v578_v12 = vpop.permute.xlu1 %577  ;;  %1339 = vmatmul.mubr.msk.f32.vlgmr.msra.gmra.mxu1 %vm405_vm2, %v1545_v8 }
 0x14e   : > { %1342 = vmatpush3.msra.mxu1 %v498_v10  ;;  %1343 = vmatprep.mubr.msk.f32.mxu1 %vm1438_vm0, %v1437_v1 }
 0x14f   : > { %1346 = vmatprep.subr.mxu1 %v1437_v1 }
 0x151   : > { %v576_v13 = vpop.permute.xlu1 %575 }
 0x155   : > { %v745_v14 = vpop.permute.xlu1 %744 }
 0x156   : > { %1357 = vmatpush3.xpose.msk.msra.mxu0 %vm405_vm2, %v745_v14 }
 0x157   : > { %1366 = vmatprep.subr.mxu0 %v1437_v1 }
 0x159   : > { %v743_v15 = vpop.permute.xlu1 %742 }
 0x15a   : > { %1359 = vmatmul.mubr.msk.f32.vlgmr.msra.gmra.mxu0 %vm405_vm2, %v743_v15 }
 0x15b   : > { %1368 = vmatprep.mubr.msk.f32.mxu0 %vm1438_vm0, %v1437_v1 }
 0x15d   : > { %v912_v16 = vpop.permute.xlu1 %911 }
 0x15e   : > { %1367 = vmatpush3.xpose.msk.msra.mxu0 %vm405_vm2, %v912_v16 }
 0x15f   : > { %1376 = vmatprep.subr.mxu0 %v1437_v1 }
 0x161   : > { %v910_v17 = vpop.permute.xlu1 %909 }
 0x162   : > { %1369 = vmatmul.mubr.msk.f32.vlgmr.msra.gmra.mxu0 %vm405_vm2, %v910_v17 }
 0x163   : > { %1384 = vmatprep.mubr.msk.f32.mxu0 %vm1438_vm0, %v1437_v1  ;;  %1377 = vmatpush3.msra.mxu0 %v1096_v3 }
 0x164   : > { %1378 = vmatprep.subr.mxu0 %v1437_v1 }
 0x165   : > { %1379 = vmatpush3.msra.mxu0 %v1095_v6 }
 0x166   : > { %1380 = vmatprep.subr.mxu0 %v1437_v1 }
 0x167   : > { %1381 = vmatpush3.msra.mxu0 %v1094_v7 }
 0x168   : > { %1382 = vmatprep.subr.mxu0 %v1437_v1 }
 0x20d   : > { %v476_v18 = vpop.f32.mrf.mxu1 }
 0x20e   : > { %v480_v20 = vmul.f32 0.35355338, %v476_v18 }
 0x20f   : > { %v1340_v21 = vpop.f32.mrf.mxu1 }
 0x210   : > { %v487_v22 = vadd.f32 %v1282_v19, %v480_v20 }
 0x212   : > { %v488_v23 = vsel %vm405_vm2, %v487_v22, -inf }
 0x213   : > { %489 = vmax.xlane.f32.xlu0 %v488_v23 }
 0x21a   : > { %v816_v24 = vpop.f32.mrf.mxu0 }
 0x21b   : > { %v820_v28 = vmul.f32 0.35355338, %v816_v24 }
 0x21c   : > { %v1360_v25 = vpop.f32.mrf.mxu0 }
 0x21d   : > { %v821_v30 = vadd.f32 %v1282_v19, %v820_v28 }
 0x21f   : > { %v822_v31 = vsel %vm405_vm2, %v821_v30, -inf }
 0x222   : > { %v983_v26 = vpop.f32.mrf.mxu0 }
 0x223   : > { %v987_v29 = vmul.f32 0.35355338, %v983_v26 }
 0x224   : > { %v1370_v27 = vpop.f32.mrf.mxu0 }
 0x225   : > { %v988_v32 = vadd.f32 %v1282_v19, %v987_v29  ;;  %v1293_v29 = vld [vmem:[%s1650_s5] ss:$0 sm:$0xff] }
 0x227   : > { %v989_v33 = vsel %vm405_vm2, %v988_v32, -inf }
 0x229   : > { %664 = vrot.lane.b32.xlu0 %v1545_v8, %s1447_s12 }
 0x248   : > { %823 = vmax.xlane.f32.xlu0 %v822_v31 }
 0x24c   : > { %990 = vmax.xlane.f32.xlu0 %v989_v33 }
 0x262   : > { %998 = vrot.lane.b32.xlu0 %v1545_v8, %s1448_s14 }
 0x29c   : > { %v490_v34 = vpop.xlane.xlu0 %489 }
 0x29d   : > { %v491_v35 = vsub.f32 %v487_v22, %v490_v34 }
 0x29f   : > { %v492_v36 = vmul.f32 1.442695, %v491_v35 }
 0x2a0   : > { %v665_v38 = vpop.permute.xlu0 %664 }
 0x2a1   : > { %1411 = vpow2.f32 %v492_v36 }
 0x2ae   : > { %v1412_v37 = vpop.eup %1411 }
 0x2af   : > { %1344 = vmatmul.mubr.msk.f32.vlgmr.msra.gmra.mxu1 %vm405_vm2, %v1412_v37  ;;  %v494_v63 = vsel %vm405_vm2, %v1412_v37, 0.0 }
 0x2b0   : > { %1347 = vmatpush3.xpose.msk.msra.mxu1 %vm405_vm2, %v578_v12  ;;  %1348 = vmatprep.mubr.msk.f32.mxu1 %vm1438_vm0, %v1437_v1 }
 0x2b1   : > { %1351 = vmatprep.subr.mxu1 %v1437_v1 }
 0x2b3   : > { %1349 = vmatmul.mubr.msk.f32.vlgmr.msra.gmra.mxu1 %vm405_vm2, %v576_v13 }
 0x2b4   : > { %1352 = vmatpush3.msra.mxu1 %v665_v38  ;;  %1353 = vmatprep.mubr.msk.f32.mxu1 %vm1438_vm0, %v1437_v1 }
 0x2b5   : > { %1361 = vmatprep.subr.mxu1 %v1437_v1 }
 0x2d1   : > { %v824_v46 = vpop.xlane.xlu0 %823 }
 0x2d2   : > { %v825_v47 = vsub.f32 %v821_v30, %v824_v46 }
 0x2d4   : > { %v826_v48 = vmul.f32 1.442695, %v825_v47 }
 0x2d5   : > { %v991_v51 = vpop.xlane.xlu0 %990 }
 0x2d6   : > { %1413 = vpow2.f32 %v826_v48  ;;  %v992_v52 = vsub.f32 %v988_v32, %v991_v51 }
 0x2d8   : > { %v993_v55 = vmul.f32 1.442695, %v992_v52 }
 0x2d9   : > { %v999_v61 = vpop.permute.xlu0 %998 }
 0x2e3   : > { %v1414_v49 = vpop.eup %1413 }
 0x2e4   : > { %v828_v50 = vsel %vm405_vm2, %v1414_v49, 0.0 }
 0x36f   : > { %v1590_v39 = vpop.f32.mrf.mxu1 }
 0x371   : > { %v1345_v40 = vpop.f32.mrf.mxu1 }
 0x373   : > { %v649_v41 = vpop.f32.mrf.mxu1 }
 0x374   : > { %v653_v42 = vmul.f32 0.35355338, %v649_v41 }
 0x375   : > { %v1350_v43 = vpop.f32.mrf.mxu1 }
 0x376   : > { %v654_v44 = vadd.f32 %v1282_v19, %v653_v42 }
 0x378   : > { %v655_v45 = vsel %vm405_vm2, %v654_v44, -inf }
 0x379   : > { %656 = vmax.xlane.f32.xlu1 %v655_v45  ;;  %v1296_v45 = vld [vmem:[%s1652_s7] ss:$0 sm:$0xff] }
 0x38a   : > { %831 = vrot.lane.b32.xlu1 %v1545_v8, %s1449_s15  ;;  %v1093_v8 = vld [vmem:[%s1649_s4] sm:$0xff] }
 0x38b   : > { %1383 = vmatpush3.msra.mxu0 %v1093_v8 }
 0x3ae   : > { %829 = vadd.xlane.f32.xlu1 %v828_v50 }
 0x402   : > { %v657_v53 = vpop.xlane.xlu1 %656 }
 0x403   : > { %v658_v54 = vsub.f32 %v654_v44, %v657_v53 }
 0x405   : > { %v659_v56 = vmul.f32 1.442695, %v658_v54 }
 0x406   : > { %v832_v58 = vpop.permute.xlu1 %831 }
 0x407   : > { %1415 = vpow2.f32 %v659_v56 }
 0x408   : > { %1417 = vpow2.f32 %v993_v55 }
 0x414   : > { %v1416_v57 = vpop.eup %1415 }
 0x415   : > { %1354 = vmatmul.mubr.msk.f32.vlgmr.msra.gmra.mxu1 %vm405_vm2, %v1416_v57  ;;  %v661_v59 = vsel %vm405_vm2, %v1416_v57, 0.0  ;;  %v1418_v60 = vpop.eup %1417 }
 0x416   : > { %1362 = vmatpush3.msra.mxu1 %v832_v58  ;;  %662 = vadd.xlane.f32.xlu0 %v661_v59  ;;  %v995_v62 = vsel %vm405_vm2, %v1418_v60, 0.0 }
 0x417   : > { %1363 = vmatprep.mubr.msk.f32.mxu1 %vm1438_vm0, %v1437_v1  ;;  %1371 = vmatprep.subr.mxu1 %v1437_v1 }
 0x419   : > { %1364 = vmatmul.mubr.msk.f32.vlgmr.msra.gmra.mxu1 %vm405_vm2, %v1414_v49 }
 0x41a   : > { %1372 = vmatpush3.msra.mxu1 %v999_v61  ;;  %996 = vadd.xlane.f32.xlu0 %v995_v62 }
 0x41b   : > { %1373 = vmatprep.mubr.msk.f32.mxu1 %vm1438_vm0, %v1437_v1 }
 0x41d   : > { %1374 = vmatmul.mubr.msk.f32.vlgmr.msra.gmra.mxu1 %vm405_vm2, %v1418_v60 }
 0x41e   : > { %495 = vadd.xlane.f32.xlu0 %v494_v63 }
 0x437   : > { %v830_v2 = vpop.xlane.xlu1 %829 }
 0x49f   : > { %v663_v0 = vpop.xlane.xlu0 %662 }
 0x4a0   : > { %1419 = vrcp.f32 %v663_v0 }
 0x4a1   : > { %1421 = vrcp.f32 %v830_v2 }
 0x4a3   : > { %v997_v4 = vpop.xlane.xlu0 %996 }
 0x4a4   : > { %1423 = vrcp.f32 %v997_v4 }
 0x4a7   : > { %v496_v20 = vpop.xlane.xlu0 %495 }
 0x4a8   : > { %1425 = vrcp.f32 %v496_v20 }
 0x4ad   : > { %v1420_v9 = vpop.eup %1419 }
 0x4ae   : > { %v1422_v13 = vpop.eup %1421 }
 0x4b1   : > { %v1424_v17 = vpop.eup %1423 }
 0x4b5   : > { %v1426_v21 = vpop.eup %1425 }
 0x4b6   : > { %v574_v23 = vmul.f32 %v1426_v21, %v1590_v39 }
 0x4d5   : > { %v736_v10 = vpop.f32.mrf.mxu1 }
 0x4d6   : > { %v741_v11 = vmul.f32 %v1420_v9, %v736_v10 }
 0x4d7   : > { %v1355_v12 = vpop.f32.mrf.mxu1 }
 0x4d8   : > { %1077 = vrot.lane.b32.xlu0 %v741_v11, %s1450_s24 }
 0x4d9   : > { %v903_v14 = vpop.f32.mrf.mxu1 }
 0x4da   : > { %v908_v15 = vmul.f32 %v1422_v13, %v903_v14 }
 0x4db   : > { %v1365_v16 = vpop.f32.mrf.mxu1 }
 0x4dc   : > { %1081 = vrot.lane.b32.xlu1 %v908_v15, %s1451_s25 }
 0x4dd   : > { %v1070_v18 = vpop.f32.mrf.mxu1 }
 0x4de   : > { %v1075_v1 = vmul.f32 %v1424_v17, %v1070_v18 }
 0x4df   : > { %v1375_v19 = vpop.f32.mrf.mxu1 }
 0x4e0   : > { %1085 = vrot.lane.b32.xlu0 %v1075_v1, %s1452_s26 }
 0x54a   : > { %v1078_v22 = vpop.permute.xlu0 %1077 }
 0x54b   : > { %v1088_v25 = vsel %vm405_vm2, %v574_v23, %v1078_v22 }
 0x54e   : > { %v1082_v24 = vpop.permute.xlu1 %1081 }
 0x54f   : > { %v1090_v26 = vsel %vm1089_vm3, %v1088_v25, %v1082_v24 }
 0x552   : > { %v1086_v27 = vpop.permute.xlu0 %1085 }
 0x553   : > { %v1092_v28 = vsel %vm1091_vm4, %v1090_v26, %v1086_v27 }
 0x554   : > { %1385 = vmatmul.mubr.msk.f32.vlgmr.msra.gmra.mxu0 %vm328_vm1, %v1092_v28 }
 0x614   : > { %v1173_v30 = vpop.f32.mrf.mxu0 }
 0x615   : > { %v1174_v31 = vadd.f32 %v1293_v29, %v1173_v30 }
 0x616   : > { %v1386_v32 = vpop.f32.mrf.mxu0 }
 0x617   : > { %v1177_v33 = vadd.f32 %v1174_v31, %v1534_v5  ;;  %v1295_v5 = vld [vmem:[%s1651_s6] ss:$0 sm:$0xff] }
 0x619   : > { %v1180_v34 = vsel %vm328_vm1, %v1177_v33, 0.0 }
 0x61a   : > { %1181 = vadd.xlane.f32.xlu0 %v1180_v34 }
 0x6a3   : > { %v1182_v35 = vpop.xlane.xlu0 %1181 }
 0x6a4   : > { %v1184_v36 = vmul.f32 0.03125, %v1182_v35 }
 0x6a6   : > { %v1185_v37 = vsub.f32 %v1177_v33, %v1184_v36 }
 0x6a8   : > { %v1186_v38 = vmul.f32 %v1185_v37, %v1185_v37 }
 0x6aa   : > { %v1187_v39 = vsel %vm328_vm1, %v1186_v38, 0.0 }
 0x6ab   : > { %1188 = vadd.xlane.f32.xlu1 %v1187_v39 }
 0x734   : > { %v1189_v40 = vpop.xlane.xlu1 %1188 }
 0x735   : > { %v1190_v41 = vmul.f32 0.03125, %v1189_v40 }
 0x737   : > { %v1191_v42 = vadd.f32 1e-12, %v1190_v41 }
 0x739   : > { %1427 = vrsqrt.f32 %v1191_v42 }
 0x746   : > { %v1428_v43 = vpop.eup %1427 }
 0x747   : > { %v1193_v44 = vmul.f32 %v1428_v43, %v1185_v37 }
 0x749   : > { %v1200_v46 = vmul.f32 %v1295_v5, %v1193_v44 }
 0x74b   : > { %v1207_v47 = vadd.f32 %v1296_v45, %v1200_v46 }
 0x74d   : > { %1208 = vst.msk [vmem:[%s314_s16] sm:$0xff] %vm328_vm1, %v1207_v47 }
 0x74e PF: > { %s18_s27 = sadd.s32 1, %s1435_s27  }
 0x74f   : > { %p15_p4 = scmp.ge.s32.totalorder %s18_s27, 4  }
 0x751   :  { %17 = sbr.rel (!%p15_p4) target bundleno = 1 (0x1), region = 85 }

// kernel: bert_encoder_forward.4
= control target key start
LH: loop header
LB: loop body
LE: loop exit
PB: predicated region body
PF: predicated region fallthrough
CT: control target
= control target key end

     0   :  { %13 = vsyncpa [#allocation3], 0  ;;  %s2134_s0 = inlined_call_operand.hbm [shape: f32[2,8,32], index: 0, kind: input, shape index: {}]   ;;  %s2135_s1 = inlined_call_operand.vmem [shape: f32[2,1,1,8], index: 1, kind: input, shape index: {}]   ;;  %s2136_s2 = inlined_call_operand.hbm [shape: f32[32,96], index: 2, kind: input, shape index: {}]   ;;  %s2137_s3 = inlined_call_operand.vmem [shape: f32[1,96], index: 3, kind: input, shape index: {}]   ;;  %s2138_s4 = inlined_call_operand.hbm [shape: f32[32,32], index: 4, kind: input, shape index: {}]   ;;  %s2139_s5 = inlined_call_operand.vmem [shape: f32[1,32], index: 5, kind: input, shape index: {}]   ;;  %s2140_s6 = inlined_call_operand.hbm [shape: f32[1,32], index: 6, kind: input, shape index: {}]   ;;  %s2141_s7 = inlined_call_operand.hbm [shape: f32[1,32], index: 7, kind: input, shape index: {}]   ;;  %s2142_s8 = inlined_call_operand.vmem [shape: f32[2,8,32], index: 8, kind: output, shape index: {}]  }
   0x1   :  { %15 = vsyncpa [#allocation3 + $0x1], 0 }
   0x2   :  { %16 = vsyncpa [#allocation5], 0 }
   0x3   :  { %17 = vsyncpa [#allocation8], 0  ;;  %s1880_s27 = smov 0   ;;  %s1882_s28 = smov 0  }
   0x4   :  { %s1884_s29 = smov 0   ;;  %s1886_s30 = smov 0  }
   0x5 LB: > { %s1812_s9 = smov [#allocation4]   ;;  %s1901_s11 = sadd.s32 4294967295, %s1810_s30   ;;  %s1810_s30 = sphi %s1886_s30, %s2159_s30   ;;  %s1806_s29 = sphi %s1884_s29, %s2158_s29   ;;  %s1802_s28 = sphi %s1882_s28, %s2157_s28   ;;  %s1798_s27 = sphi %s1880_s27, %s2156_s27  }
   0x6   : > { %s244_s10 = sshll.u32 %s1812_s9, 4  ;;  %p1396_p0 = scmp.ge.s32.totalorder %s1810_s30, 1  ;;  %s245_s10 = int_to_ptr.vmem [resolvable:$true] %s244_s10 }
   0x7   : > { %p2143_p1 = scmp.eq.s32.totalorder %s1901_s11, 0  ;;  %p232_p2 = scmp.lt.s32.totalorder %s1810_s30, 3 }
   0x8   : > { %s1813_s13 = smov [#allocation7]   ;;  %s1814_s16 = smov [#allocation6]  }
   0x9   : > { %p1906_p3 = pnand %p1396_p0, %p232_p2  ;;  %s277_s14 = sshll.u32 %s1813_s13, 4  ;;  %s278_s14 = int_to_ptr.vmem [resolvable:$true] %s277_s14 }
   0xa   : > { %s260_s17 = sshll.u32 %s1814_s16, 4  ;;  %s1647_s18 = scalar_lea.vmem %s245_s10, 512  ;;  %s1918_s17 = int_to_ptr.vmem [resolvable:$true] %s260_s17 }
   0xb   : > { %s2146_s12 = scalar_select %p1906_p3, 1, 0 }
   0xc   : > { %p1538_p4 = pneg %p1906_p3  ;;  %p1648_p7 = scmp.ne.s32.totalorder %s245_s10, %s1647_s18 }
   0xd   : > { %p1655_p10 = scmp.lt.s32.totalorder %s245_s10, %s245_s10  ;;  %p1656_p11 = scmp.lt.s32.totalorder %s1647_s18, %s1647_s18 }
   0xe   : > { %p1914_p5 = pnand %p1538_p4, %p2143_p1 }
   0xf   : > { %p1657_p12 = por %p1656_p11, %p1655_p10 }
  0x10   : > { %p1638_p6 = pneg %p1914_p5 }
  0x12   : > { %p1650_p8 = pnand %p1648_p7, %p1638_p6 }
  0x14   : > { %p1651_p9 = pneg %p1650_p8 }
  0x16   : > { %p1658_p13 = pnand %p1657_p12, %p1651_p9 }
  0x18   : > { %1661 = shalt.err (!%p1658_p13)
}
  0x19   : > { %s1815_s19 = smov 128   ;;  %s1816_s20 = smov 8  }
  0x1a   : > { %1541 = dma.hbm_to_vmem [thread:$0]  (!%p1914_p5), %s2136_s2, 512, %s245_s10, [#allocation5], %s1815_s19, %s1815_s19, %s1816_s20  }
  0x1b   : > { %s1673_s23 = scalar_lea.vmem %s278_s14, 16  ;;  %s1680_s24 = scalar_lea.vmem %s278_s14, 32 }
  0x1c   : > { %p1674_p0 = scmp.ne.s32.totalorder %s278_s14, %s1673_s23  ;;  %p1681_p7 = scmp.lt.s32.totalorder %s278_s14, %s278_s14 }
  0x1d   : > { %p1682_p8 = scmp.lt.s32.totalorder %s1680_s24, %s1673_s23 }
  0x1e   : > { %p1676_p2 = pnand %p1674_p0, %p1638_p6 }
  0x1f   : > { %p1683_p9 = por %p1682_p8, %p1681_p7 }
  0x20   : > { %p1677_p4 = pneg %p1676_p2 }
  0x22   : > { %p1684_p10 = pnand %p1683_p9, %p1677_p4 }
  0x24   : > { %1687 = shalt.err (!%p1684_p10)
}
  0x25   : > { %1547 = dma.hbm_to_vmem [thread:$0]  (!%p1914_p5), %s2140_s6, 16, %s278_s14, [#allocation8]  }
  0x26   : > { %s1699_s9 = scalar_lea.vmem %s1918_s17, 512  ;;  %p1707_p0 = scmp.lt.s32.totalorder %s1918_s17, %s1918_s17 }
  0x27   : > { %p1700_p11 = scmp.ne.s32.totalorder %s1918_s17, %s1699_s9  ;;  %p1708_p2 = scmp.lt.s32.totalorder %s1699_s9, %s1699_s9 }
  0x29   : > { %p1702_p12 = pnand %p1700_p11, %p1638_p6  ;;  %p1709_p4 = por %p1708_p2, %p1707_p0 }
  0x2b   : > { %p1703_p13 = pneg %p1702_p12 }
  0x2d   : > { %p1710_p7 = pnand %p1709_p4, %p1703_p13 }
  0x2f   : > { %1713 = shalt.err (!%p1710_p7)
}
  0x30   : > { %1544 = dma.hbm_to_vmem [thread:$0]  (!%p1914_p5), %s2138_s4, 512, %s1918_s17, [#allocation5], %s1815_s19, %s1815_s19, %s1816_s20  }
  0x31   : > { %s1817_s14 = smov [#allocation9]  }
  0x32   : > { %s288_s16 = sshll.u32 %s1817_s14, 4  ;;  %s289_s16 = int_to_ptr.vmem [resolvable:$true] %s288_s16 }
  0x33   : > { %s1725_s18 = scalar_lea.vmem %s289_s16, 16  ;;  %s1732_s21 = scalar_lea.vmem %s289_s16, 32 }
  0x34   : > { %p1726_p8 = scmp.ne.s32.totalorder %s289_s16, %s1725_s18  ;;  %p1733_p11 = scmp.lt.s32.totalorder %s289_s16, %s289_s16 }
  0x35   : > { %p1734_p12 = scmp.lt.s32.totalorder %s1732_s21, %s1725_s18 }
  0x36   : > { %p1728_p9 = pnand %p1726_p8, %p1638_p6 }
  0x37   : > { %p1735_p13 = por %p1734_p12, %p1733_p11 }
  0x38   : > { %p1729_p10 = pneg %p1728_p9 }
  0x3a   : > { %p1736_p0 = pnand %p1735_p13, %p1729_p10 }
  0x3c   : > { %1739 = shalt.err (!%p1736_p0)
}
  0x3d   : > { %1550 = dma.hbm_to_vmem [thread:$0]  (!%p1914_p5), %s2141_s7, 16, %s289_s16, [#allocation8]  }
  0x3e   : > { %s1960_s17 = sadd.s32 1, %s1810_s30   ;;  %s30_s15 = sadd.s32 1, %s1806_s29 }
  0x3f   : > { %s27_s19 = ssub.s32 %s1810_s30, %s1960_s17  ;;  %p37_p6 = scmp.ne.s32.totalorder %s1806_s29, %s1802_s28 }
  0x40   : > { %p28_p2 = scmp.eq.s32.totalorder %s27_s19, 0  ;;  %p38_p4 = scmp.eq.s32.totalorder %s1810_s30, 0 }
  0x41   : > { %p43_p7 = scmp.ne.s32.totalorder %s1802_s28, %s1798_s27  ;;  %p1559_p8 = scmp.lt.s32.totalorder %s1810_s30, 2 }
  0x42   : > { %s1972_s20 = scalar_select %p28_p2, %s1806_s29, %s30_s15  }
  0x43   : > { %p39_p9 = por %p38_p4, %p37_p6  ;;  %p1976_p10 = por %p2143_p1, %p43_p7 }
  0x44   : > { %s299_s25 = sand.u32 1, %s1806_s29   ;;  %s1403_s26 = sshll.u32 %s1810_s30, 7 }
  0x45   : > { %s2148_s24 = scalar_select %p1976_p10, 1, 0 }
  0x46   : > { %s1402_s9 = sshll.u32 %s299_s25, 3  ;;  %s1985_s14 = scalar_lea.hbm %s2134_s0, %s1403_s26 }
  0x47   : > { %s303_s27 = scalar_lea.vmem [#allocation2], %s1402_s9  ;;  %p1987_p5 = pnand %p1559_p8, %p39_p9 }
  0x48   : > { %s310_s16 = sshll.u32 %s303_s27, 4  ;;  %s300_s21 = scalar_lea.sflag [#allocation3], %s299_s25  ;;  %s311_s16 = int_to_ptr.vmem [resolvable:$true] %s310_s16 }
  0x49   : > { %s1740_s22 = scalar_lea.hbm %s1985_s14, 128  ;;  %p1742_p12 = pneg %p1987_p5 }
  0x4a   : > { %p1741_p11 = scmp.ne.s32.totalorder %s1985_s14, %s1740_s22  ;;  %s1745_s15 = scalar_lea.hbm %s2134_s0, 256 }
  0x4b   : > { %p1746_p6 = scmp.lt.s32.totalorder %s1985_s14, %s2134_s0  ;;  %p1747_p2 = scmp.lt.s32.totalorder %s1745_s15, %s1740_s22 }
  0x4c   : > { %p1743_p13 = pnand %p1742_p12, %p1741_p11 }
  0x4d   : > { %p1748_p4 = por %p1747_p2, %p1746_p6 }
  0x4e   : > { %p1744_p0 = pneg %p1743_p13 }
  0x50   : > { %p1749_p7 = pnand %p1748_p4, %p1744_p0 }
  0x52   : > { %1752 = shalt.err (!%p1749_p7)
}
  0x53   : > { %s1753_s9 = scalar_lea.vmem %s311_s16, 128  ;;  %s1818_s25 = smov [#allocation2]  }
  0x54   : > { %p1754_p8 = scmp.ne.s32.totalorder %s311_s16, %s1753_s9  ;;  %s1758_s10 = sshll.u32 %s1818_s25, 4  ;;  %s1759_s10 = int_to_ptr.vmem [resolvable:$false] %s1758_s10 }
  0x55   : > { %s1760_s13 = scalar_lea.vmem %s1759_s10, 256  ;;  %p1761_p11 = scmp.lt.s32.totalorder %s311_s16, %s1759_s10 }
  0x56   : > { %p1756_p9 = pnand %p1754_p8, %p1742_p12  ;;  %p1762_p13 = scmp.lt.s32.totalorder %s1760_s13, %s1753_s9 }
  0x58   : > { %p1757_p1 = pneg %p1756_p9  ;;  %p1763_p10 = por %p1762_p13, %p1761_p11 }
  0x5a   : > { %p1764_p3 = pnand %p1763_p10, %p1757_p1 }
  0x5c   : > { %1767 = shalt.err (!%p1764_p3)
}
  0x5d   : > { %1554 = dma.hbm_to_vmem [thread:$0]  (!%p1987_p5), %s1985_s14, 128, %s311_s16, %s300_s21  }
  0x5e   : > { %p2150_p0 = scmp.ne.s32.totalorder %s2146_s12, 0 }
  0x5f   : > { %s327_s27 = sand.u32 (!%p2150_p0), 1, %s1802_s28   ;;  %p2151_p12 = scmp.ne.s32.totalorder (!%p2150_p0), %s2148_s24, 0 }
  0x60   : > { %325 = sbr.rel (%p2150_p0) target bundleno = 1968 (0x7b0), region = 52  ;;  %s1405_s22 = sshll.u32 (!%p2150_p0), %s327_s27, 3 }
  0x61   : > { %s328_s30 = scalar_lea.sflag (!%p2150_p0), [#allocation3], %s327_s27  ;;  %s331_s23 = scalar_lea.vmem (!%p2150_p0), [#allocation2], %s1405_s22 }
  0x65   : > { %1785 = dma.done.wait (%p2151_p12), %s328_s30, 128  }
  0x66   : > { %1787 = vsyncadd (%p2151_p12), %s328_s30, 4294967168  ;;  %p2152_p1 = scmp.eq.s32.totalorder %s1901_s11, 0 }
  0x68   : > { %1789 = dma.done.wait (%p2152_p1), [#allocation5], 1024   ;;  %p2153_p3 = pmov %p2152_p1 }
  0x69   : > { %p2154_p10 = pmov %p2152_p1 }
  0x6a   : > { %1791 = vsyncadd (%p2153_p3), [#allocation5], 4294966272 }
  0x6b   : > { %1793 = dma.done.wait (%p2154_p10), [#allocation8], 32   ;;  %p2155_p5 = pmov %p2152_p1 }
  0x6c   : > { %v1819_v0 = vmov 0.0   ;;  %vm1820_vm0 = vmmov 0   ;;  %v394_v1 = vld [vmem:[#allocation4 + $0x18] sm:$0xff]  ;;  %v393_v2 = vld [vmem:[#allocation4 + $0x10] sm:$0xff]  ;;  %v392_v3 = vld [vmem:[#allocation4 + $0x8] sm:$0xff]  ;;  %vm402_vm1 = vcmask 261120  }
  0x6d   : > { %1795 = vsyncadd (%p2155_p5), [#allocation8], 4294967264  ;;  %1458 = vmatprep.subr.mxu0 %v1819_v0  ;;  %1466 = vmatprep.mubr.msk.f32.mxu0 %vm1820_vm0, %v1819_v0  ;;  %v391_v4 = vld [vmem:[#allocation4] sm:$0xff]  ;;  %v2028_v5 = vld [vmem:[%s331_s23] sm:$0xff]  ;;  %s1821_s14 = smov 64   ;;  %s1822_s16 = smov 96  }
  0x6e   : > { %1469 = vmatprep.subr.mxu1 %v1819_v0  ;;  %1471 = vmatprep.mubr.msk.f32.mxu1 %vm1820_vm0, %v1819_v0  ;;  %v1411_v6 = vld [vmem:[%s2137_s3] ss:$0 sm:$0xff]  ;;  %s1823_s18 = smov 88   ;;  %s1824_s21 = smov 120   ;;  %vm479_vm2 = vcmask 64512   ;;  %vm1163_vm3 = vcmask 130048  }
  0x6f   : > { %1459 = vmatpush3.msra.mxu0 %v394_v1  ;;  %s1825_s15 = smov 80   ;;  %s1826_s19 = smov 112   ;;  %vm1165_vm4 = vcmask 195584  }
  0x70   : > { %1460 = vmatprep.subr.mxu0 %v1819_v0  ;;  %s1827_s26 = smov 72   ;;  %s1828_s9 = smov 104  }
  0x71   : > { %1461 = vmatpush3.msra.mxu0 %v393_v2  ;;  %p382_p6 = scmp.lt.s32.totalorder %s1901_s11, 1  ;;  %s1829_s27 = smov 56  }
  0x72   : > { %1462 = vmatprep.subr.mxu0 %v1819_v0  ;;  %s1830_s22 = smov 40   ;;  %s1831_s30 = smov 48  }
  0x73   : > { %1463 = vmatpush3.msra.mxu0 %v392_v3  ;;  %s2161_s11 = smov (!%p382_p6, %s1901_s11), 1  ;;  %v1170_v3 = vld [vmem:[#allocation6 + $0x18] sm:$0xff]  ;;  %s1832_s23 = smov 8  }
  0x74   : > { %1464 = vmatprep.subr.mxu0 %v1819_v0  ;;  %s384_s13 = scalar_lea.vmem %s2135_s1, %s2161_s11  ;;  %s1833_s12 = smov 16  }
  0x75   : > { %1465 = vmatpush3.msra.mxu0 %v391_v4  ;;  %v1415_v19 = vld [vmem:[%s384_s13] ss:$0 sm:$0xff]  ;;  %s1834_s24 = smov 24  }
  0x76   : > { %1467 = vmatmul.mubr.msk.f32.vlgmr.msra.gmra.mxu0 %vm402_vm1, %v2028_v5  ;;  %1489 = vmatprep.subr.mxu0 %v1819_v0 }
  0x77   : > { %1491 = vmatprep.mubr.msk.f32.mxu0 %vm1820_vm0, %v1819_v0 }
 0x136   : > { %v472_v7 = vpop.f32.mrf.mxu0 }
 0x137   : > { %v2039_v8 = vadd.f32 %v1411_v6, %v472_v7  ;;  %v1169_v6 = vld [vmem:[#allocation6 + $0x10] sm:$0xff]  ;;  %v1168_v7 = vld [vmem:[#allocation6 + $0x8] sm:$0xff] }
 0x138   : > { %v1468_v9 = vpop.f32.mrf.mxu0 }
 0x139   : > { %571 = vrot.lane.b32.xlu1 %v2039_v8, %s1821_s14  ;;  %477 = vrot.lane.b32.xlu0 %v2039_v8, %s1822_s16 }
 0x13d   : > { %651 = vrot.lane.b32.xlu1 %v2039_v8, %s1823_s18  ;;  %s1410_s18 = sshll.u32 %s2161_s11, 3 }
 0x141   : > { %649 = vrot.lane.b32.xlu1 %v2039_v8, %s1824_s21 }
 0x145   : > { %818 = vrot.lane.b32.xlu1 %v2039_v8, %s1825_s15 }
 0x149   : > { %816 = vrot.lane.b32.xlu1 %v2039_v8, %s1826_s19  ;;  %s388_s19 = scalar_lea.vmem %s2142_s8, %s1410_s18 }
 0x14d   : > { %985 = vrot.lane.b32.xlu1 %v2039_v8, %s1827_s26 }
 0x151   : > { %983 = vrot.lane.b32.xlu1 %v2039_v8, %s1828_s9 }
 0x1ab   : > { %v572_v10 = vpop.permute.xlu1 %571  ;;  %v478_v11 = vpop.permute.xlu0 %477 }
 0x1ac   : > { %1470 = vmatpush3.xpose.msk.msra.mxu1 %vm479_vm2, %v478_v11 }
 0x1ad   : > { %1474 = vmatprep.subr.mxu1 %v1819_v0 }
 0x1af   : > { %v652_v12 = vpop.permute.xlu1 %651  ;;  %1472 = vmatmul.mubr.msk.f32.vlgmr.msra.gmra.mxu1 %vm479_vm2, %v2039_v8 }
 0x1b0   : > { %1475 = vmatpush3.msra.mxu1 %v572_v10  ;;  %1476 = vmatprep.mubr.msk.f32.mxu1 %vm1820_vm0, %v1819_v0 }
 0x1b1   : > { %1479 = vmatprep.subr.mxu1 %v1819_v0 }
 0x1b3   : > { %v650_v13 = vpop.permute.xlu1 %649 }
 0x1b7   : > { %v819_v14 = vpop.permute.xlu1 %818 }
 0x1b8   : > { %1490 = vmatpush3.xpose.msk.msra.mxu0 %vm479_vm2, %v819_v14 }
 0x1b9   : > { %1499 = vmatprep.subr.mxu0 %v1819_v0 }
 0x1bb   : > { %v817_v15 = vpop.permute.xlu1 %816 }
 0x1bc   : > { %1492 = vmatmul.mubr.msk.f32.vlgmr.msra.gmra.mxu0 %vm479_vm2, %v817_v15 }
 0x1bd   : > { %1501 = vmatprep.mubr.msk.f32.mxu0 %vm1820_vm0, %v1819_v0 }
 0x1bf   : > { %v986_v16 = vpop.permute.xlu1 %985 }
 0x1c0   : > { %1500 = vmatpush3.xpose.msk.msra.mxu0 %vm479_vm2, %v986_v16 }
 0x1c1   : > { %1509 = vmatprep.subr.mxu0 %v1819_v0 }
 0x1c3   : > { %v984_v17 = vpop.permute.xlu1 %983 }
 0x1c4   : > { %1502 = vmatmul.mubr.msk.f32.vlgmr.msra.gmra.mxu0 %vm479_vm2, %v984_v17 }
 0x1c5   : > { %1517 = vmatprep.mubr.msk.f32.mxu0 %vm1820_vm0, %v1819_v0  ;;  %1510 = vmatpush3.msra.mxu0 %v1170_v3 }
 0x1c6   : > { %1511 = vmatprep.subr.mxu0 %v1819_v0 }
 0x1c7   : > { %1512 = vmatpush3.msra.mxu0 %v1169_v6 }
 0x1c8   : > { %1513 = vmatprep.subr.mxu0 %v1819_v0 }
 0x1c9   : > { %1514 = vmatpush3.msra.mxu0 %v1168_v7 }
 0x1ca   : > { %1515 = vmatprep.subr.mxu0 %v1819_v0 }
 0x26f   : > { %v550_v18 = vpop.f32.mrf.mxu1 }
 0x270   : > { %v554_v20 = vmul.f32 0.35355338, %v550_v18 }
 0x271   : > { %v1473_v21 = vpop.f32.mrf.mxu1 }
 0x272   : > { %v561_v22 = vadd.f32 %v1415_v19, %v554_v20 }
 0x274   : > { %v562_v23 = vsel %vm479_vm2, %v561_v22, -inf }
 0x275   : > { %563 = vmax.xlane.f32.xlu0 %v562_v23 }
 0x27c   : > { %v890_v24 = vpop.f32.mrf.mxu0 }
 0x27d   : > { %v894_v28 = vmul.f32 0.35355338, %v890_v24 }
 0x27e   : > { %v1493_v25 = vpop.f32.mrf.mxu0 }
 0x27f   : > { %v895_v30 = vadd.f32 %v1415_v19, %v894_v28 }
 0x281   : > { %v896_v31 = vsel %vm479_vm2, %v895_v30, -inf }
 0x284   : > { %v1057_v26 = vpop.f32.mrf.mxu0 }
 0x285   : > { %v1061_v29 = vmul.f32 0.35355338, %v1057_v26 }
 0x286   : > { %v1503_v27 = vpop.f32.mrf.mxu0 }
 0x287   : > { %v1062_v32 = vadd.f32 %v1415_v19, %v1061_v29  ;;  %v1426_v29 = vld [vmem:[%s2139_s5] ss:$0 sm:$0xff] }
 0x289   : > { %v1063_v33 = vsel %vm479_vm2, %v1062_v32, -inf }
 0x28b   : > { %738 = vrot.lane.b32.xlu0 %v2039_v8, %s1829_s27 }
 0x2aa   : > { %897 = vmax.xlane.f32.xlu0 %v896_v31 }
 0x2ae   : > { %1064 = vmax.xlane.f32.xlu0 %v1063_v33 }
 0x2c4   : > { %1072 = vrot.lane.b32.xlu0 %v2039_v8, %s1830_s22 }
 0x2fe   : > { %v564_v34 = vpop.xlane.xlu0 %563 }
 0x2ff   : > { %v565_v35 = vsub.f32 %v561_v22, %v564_v34 }
 0x301   : > { %v566_v36 = vmul.f32 1.442695, %v565_v35 }
 0x302   : > { %v739_v38 = vpop.permute.xlu0 %738 }
 0x303   : > { %1618 = vpow2.f32 %v566_v36 }
 0x310   : > { %v1619_v37 = vpop.eup %1618 }
 0x311   : > { %1477 = vmatmul.mubr.msk.f32.vlgmr.msra.gmra.mxu1 %vm479_vm2, %v1619_v37  ;;  %v568_v63 = vsel %vm479_vm2, %v1619_v37, 0.0 }
 0x312   : > { %1480 = vmatpush3.xpose.msk.msra.mxu1 %vm479_vm2, %v652_v12  ;;  %1481 = vmatprep.mubr.msk.f32.mxu1 %vm1820_vm0, %v1819_v0 }
 0x313   : > { %1484 = vmatprep.subr.mxu1 %v1819_v0 }
 0x315   : > { %1482 = vmatmul.mubr.msk.f32.vlgmr.msra.gmra.mxu1 %vm479_vm2, %v650_v13 }
 0x316   : > { %1485 = vmatpush3.msra.mxu1 %v739_v38  ;;  %1486 = vmatprep.mubr.msk.f32.mxu1 %vm1820_vm0, %v1819_v0 }
 0x317   : > { %1494 = vmatprep.subr.mxu1 %v1819_v0 }
 0x333   : > { %v898_v46 = vpop.xlane.xlu0 %897 }
 0x334   : > { %v899_v47 = vsub.f32 %v895_v30, %v898_v46  ;;  %v1429_v46 = vld [vmem:[#allocation9] ss:$0 sm:$0xff] }
 0x336   : > { %v900_v48 = vmul.f32 1.442695, %v899_v47 }
 0x337   : > { %v1065_v51 = vpop.xlane.xlu0 %1064 }
 0x338   : > { %1620 = vpow2.f32 %v900_v48  ;;  %v1066_v52 = vsub.f32 %v1062_v32, %v1065_v51 }
 0x33a   : > { %v1067_v55 = vmul.f32 1.442695, %v1066_v52 }
 0x33b   : > { %v1073_v61 = vpop.permute.xlu0 %1072 }
 0x345   : > { %v1621_v49 = vpop.eup %1620 }
 0x346   : > { %v902_v50 = vsel %vm479_vm2, %v1621_v49, 0.0 }
 0x3d1   : > { %v2088_v39 = vpop.f32.mrf.mxu1 }
 0x3d3   : > { %v1478_v40 = vpop.f32.mrf.mxu1 }
 0x3d5   : > { %v723_v41 = vpop.f32.mrf.mxu1 }
 0x3d6   : > { %v727_v42 = vmul.f32 0.35355338, %v723_v41 }
 0x3d7   : > { %v1483_v43 = vpop.f32.mrf.mxu1 }
 0x3d8   : > { %v728_v44 = vadd.f32 %v1415_v19, %v727_v42 }
 0x3da   : > { %v729_v45 = vsel %vm479_vm2, %v728_v44, -inf }
 0x3db   : > { %730 = vmax.xlane.f32.xlu1 %v729_v45 }
 0x3ec   : > { %905 = vrot.lane.b32.xlu1 %v2039_v8, %s1831_s30  ;;  %v1167_v8 = vld [vmem:[#allocation6] sm:$0xff] }
 0x3ed   : > { %1516 = vmatpush3.msra.mxu0 %v1167_v8 }
 0x410   : > { %903 = vadd.xlane.f32.xlu1 %v902_v50 }
 0x464   : > { %v731_v53 = vpop.xlane.xlu1 %730 }
 0x465   : > { %v732_v54 = vsub.f32 %v728_v44, %v731_v53  ;;  %v1428_v44 = vld [vmem:[#allocation7] ss:$0 sm:$0xff] }
 0x467   : > { %v733_v56 = vmul.f32 1.442695, %v732_v54 }
 0x468   : > { %v906_v58 = vpop.permute.xlu1 %905 }
 0x469   : > { %1622 = vpow2.f32 %v733_v56 }
 0x46a   : > { %1624 = vpow2.f32 %v1067_v55 }
 0x476   : > { %v1623_v57 = vpop.eup %1622 }
 0x477   : > { %1487 = vmatmul.mubr.msk.f32.vlgmr.msra.gmra.mxu1 %vm479_vm2, %v1623_v57  ;;  %v735_v59 = vsel %vm479_vm2, %v1623_v57, 0.0  ;;  %v1625_v60 = vpop.eup %1624 }
 0x478   : > { %1495 = vmatpush3.msra.mxu1 %v906_v58  ;;  %736 = vadd.xlane.f32.xlu0 %v735_v59  ;;  %v1069_v62 = vsel %vm479_vm2, %v1625_v60, 0.0 }
 0x479   : > { %1496 = vmatprep.mubr.msk.f32.mxu1 %vm1820_vm0, %v1819_v0  ;;  %1504 = vmatprep.subr.mxu1 %v1819_v0 }
 0x47b   : > { %1497 = vmatmul.mubr.msk.f32.vlgmr.msra.gmra.mxu1 %vm479_vm2, %v1621_v49 }
 0x47c   : > { %1505 = vmatpush3.msra.mxu1 %v1073_v61  ;;  %1070 = vadd.xlane.f32.xlu0 %v1069_v62 }
 0x47d   : > { %1506 = vmatprep.mubr.msk.f32.mxu1 %vm1820_vm0, %v1819_v0 }
 0x47f   : > { %1507 = vmatmul.mubr.msk.f32.vlgmr.msra.gmra.mxu1 %vm479_vm2, %v1625_v60 }
 0x480   : > { %569 = vadd.xlane.f32.xlu0 %v568_v63 }
 0x499   : > { %v904_v2 = vpop.xlane.xlu1 %903 }
 0x501   : > { %v737_v1 = vpop.xlane.xlu0 %736 }
 0x502   : > { %1626 = vrcp.f32 %v737_v1 }
 0x503   : > { %1628 = vrcp.f32 %v904_v2 }
 0x505   : > { %v1071_v4 = vpop.xlane.xlu0 %1070 }
 0x506   : > { %1630 = vrcp.f32 %v1071_v4 }
 0x509   : > { %v570_v0 = vpop.xlane.xlu0 %569 }
 0x50a   : > { %1632 = vrcp.f32 %v570_v0 }
 0x50f   : > { %v1627_v9 = vpop.eup %1626 }
 0x510   : > { %v1629_v13 = vpop.eup %1628 }
 0x513   : > { %v1631_v17 = vpop.eup %1630 }
 0x517   : > { %v1633_v21 = vpop.eup %1632 }
 0x518   : > { %v648_v23 = vmul.f32 %v1633_v21, %v2088_v39 }
 0x537   : > { %v810_v10 = vpop.f32.mrf.mxu1 }
 0x538   : > { %v815_v11 = vmul.f32 %v1627_v9, %v810_v10 }
 0x539   : > { %v1488_v12 = vpop.f32.mrf.mxu1 }
 0x53a   : > { %1151 = vrot.lane.b32.xlu0 %v815_v11, %s1832_s23 }
 0x53b   : > { %v977_v14 = vpop.f32.mrf.mxu1 }
 0x53c   : > { %v982_v15 = vmul.f32 %v1629_v13, %v977_v14 }
 0x53d   : > { %v1498_v16 = vpop.f32.mrf.mxu1 }
 0x53e   : > { %1155 = vrot.lane.b32.xlu1 %v982_v15, %s1833_s12 }
 0x53f   : > { %v1144_v18 = vpop.f32.mrf.mxu1 }
 0x540   : > { %v1149_v19 = vmul.f32 %v1631_v17, %v1144_v18 }
 0x541   : > { %v1508_v20 = vpop.f32.mrf.mxu1 }
 0x542   : > { %1159 = vrot.lane.b32.xlu0 %v1149_v19, %s1834_s24 }
 0x5ac   : > { %v1152_v22 = vpop.permute.xlu0 %1151 }
 0x5ad   : > { %v1162_v25 = vsel %vm479_vm2, %v648_v23, %v1152_v22 }
 0x5b0   : > { %v1156_v24 = vpop.permute.xlu1 %1155 }
 0x5b1   : > { %v1164_v26 = vsel %vm1163_vm3, %v1162_v25, %v1156_v24 }
 0x5b4   : > { %v1160_v27 = vpop.permute.xlu0 %1159 }
 0x5b5   : > { %v1166_v28 = vsel %vm1165_vm4, %v1164_v26, %v1160_v27 }
 0x5b6   : > { %1518 = vmatmul.mubr.msk.f32.vlgmr.msra.gmra.mxu0 %vm402_vm1, %v1166_v28 }
 0x676   : > { %v1247_v30 = vpop.f32.mrf.mxu0 }
 0x677   : > { %v1248_v31 = vadd.f32 %v1426_v29, %v1247_v30 }
 0x678   : > { %v1519_v32 = vpop.f32.mrf.mxu0 }
 0x679   : > { %v1251_v33 = vadd.f32 %v1248_v31, %v2028_v5 }
 0x67b   : > { %v1254_v34 = vsel %vm402_vm1, %v1251_v33, 0.0 }
 0x67c   : > { %1255 = vadd.xlane.f32.xlu0 %v1254_v34 }
 0x705   : > { %v1256_v35 = vpop.xlane.xlu0 %1255 }
 0x706   : > { %v1258_v36 = vmul.f32 0.03125, %v1256_v35 }
 0x708   : > { %v1259_v37 = vsub.f32 %v1251_v33, %v1258_v36 }
 0x70a   : > { %v1260_v38 = vmul.f32 %v1259_v37, %v1259_v37 }
 0x70c   : > { %v1261_v39 = vsel %vm402_vm1, %v1260_v38, 0.0 }
 0x70d   : > { %1262 = vadd.xlane.f32.xlu1 %v1261_v39 }
 0x796   : > { %v1263_v40 = vpop.xlane.xlu1 %1262 }
 0x797   : > { %v1264_v41 = vmul.f32 0.03125, %v1263_v40 }
 0x799   : > { %v1265_v42 = vadd.f32 1e-12, %v1264_v41 }
 0x79b   : > { %1634 = vrsqrt.f32 %v1265_v42 }
 0x7a8   : > { %v1635_v43 = vpop.eup %1634 }
 0x7a9   : > { %v1267_v45 = vmul.f32 %v1635_v43, %v1259_v37 }
 0x7ab   : > { %v1274_v5 = vmul.f32 %v1428_v44, %v1267_v45 }
 0x7ad   : > { %v1281_v47 = vadd.f32 %v1429_v46, %v1274_v5 }
 0x7af   : > { %1282 = vst.msk [vmem:[%s388_s19] sm:$0xff] %vm402_vm1, %v1281_v47 }
 0x7b0 PF: > { %p20_p2 = scmp.ge.s32.totalorder %s1960_s17, 4   ;;  %s2156_s27 = smov %s1802_s28 }
 0x7b1   : > { %s2157_s28 = smov %s1806_s29  ;;  %s2158_s29 = smov %s1972_s20 }
 0x7b2   : > { %s2159_s30 = smov %s1960_s17  ;;  %22 = sbr.rel (!%p20_p2) target bundleno = 5 (0x5), region = 111 }
 0x7b7   :  { %1302 = vsyncpa [#allocation3], 1 }
 0x7b8   :  { %1304 = vsyncpa [#allocation3 + $0x1], 1 }
 0x7b9   :  { %1305 = vsyncpa [#allocation5], 1 }
 0x7ba   :  { %1306 = vsyncpa [#allocation8], 1 }

// kernel: bert_encoder_forward.7
= control target key start
LH: loop header
LB: loop body
LE: loop exit
PB: predicated region body
PF: predicated region fallthrough
CT: control target
= control target key end

     0   :  { %vm40_vm0 = vcmask 261120   ;;  %s596_s0 = inlined_call_operand.vmem [shape: f32[16,32], index: 0, kind: input, shape index: {}]   ;;  %s597_s1 = inlined_call_operand.vmem [shape: f32[32,128], index: 1, kind: input, shape index: {}]   ;;  %s598_s2 = inlined_call_operand.vmem [shape: f32[1,128], index: 2, kind: input, shape index: {}]   ;;  %s599_s3 = inlined_call_operand.vmem [shape: f32[128,32], index: 3, kind: input, shape index: {}]   ;;  %s600_s4 = inlined_call_operand.vmem [shape: f32[1,32], index: 4, kind: input, shape index: {}]   ;;  %s601_s5 = inlined_call_operand.vmem [shape: f32[1,32], index: 5, kind: input, shape index: {}]   ;;  %s602_s6 = inlined_call_operand.vmem [shape: f32[1,32], index: 6, kind: input, shape index: {}]   ;;  %s603_s7 = inlined_call_operand.hbm [shape: f32[16,32], index: 7, kind: output, shape index: {}]  }
   0x1   :  { %v32_v0 = vld [vmem:[%s597_s1 + $0x18] sm:$0xff]  ;;  %v31_v1 = vld [vmem:[%s597_s1 + $0x10] sm:$0xff]  ;;  %v508_v2 = vld [vmem:[%s596_s0] sm:$0xff] }
   0x2   :  { %373 = vmatprep.subr.mxu0 %v32_v0  ;;  %v30_v3 = vld [vmem:[%s597_s1 + $0x8] sm:$0xff]  ;;  %381 = vmatprep.mubr.msk.f32.mxu0 %vm40_vm0, %v508_v2 }
   0x3   :  { %374 = vmatpush3.msra.mxu0 %v32_v0 }
   0x4   :  { %12 = vsyncpa [#allocation3], 0  ;;  %375 = vmatprep.subr.mxu0 %v31_v1  ;;  %v29_v4 = vld [vmem:[%s597_s1] sm:$0xff]  ;;  %v521_v5 = vld [vmem:[%s596_s0 + $0x8] sm:$0xff]  ;;  %s456_s23 = smov [#allocation2]  }
   0x5   :  { %376 = vmatpush3.msra.mxu0 %v31_v1  ;;  %v191_v6 = vld [vmem:[%s599_s3 + $0x78] sm:$0xff]  ;;  %v190_v7 = vld [vmem:[%s599_s3 + $0x70] sm:$0xff]  ;;  %v189_v8 = vld [vmem:[%s599_s3 + $0x68] sm:$0xff]  ;;  %s328_s24 = sshll.u32 %s456_s23, 4  ;;  %s329_s24 = int_to_ptr.vmem [resolvable:$true] %s328_s24 }
   0x6   :  { %377 = vmatprep.subr.mxu0 %v30_v3  ;;  %384 = vmatprep.subr.mxu1 %v191_v6  ;;  %v188_v9 = vld [vmem:[%s599_s3 + $0x60] sm:$0xff]  ;;  %v187_v10 = vld [vmem:[%s599_s3 + $0x58] sm:$0xff]  ;;  %v186_v11 = vld [vmem:[%s599_s3 + $0x50] sm:$0xff]  ;;  %s434_s25 = scalar_lea.vmem %s329_s24, 256  ;;  %p439_p1 = scmp.lt.s32.totalorder %s329_s24, %s329_s24 }
   0x7   :  { %378 = vmatpush3.msra.mxu0 %v30_v3  ;;  %385 = vmatpush3.msra.mxu1 %v191_v6  ;;  %v185_v12 = vld [vmem:[%s599_s3 + $0x48] sm:$0xff]  ;;  %v184_v13 = vld [vmem:[%s599_s3 + $0x40] sm:$0xff]  ;;  %v183_v14 = vld [vmem:[%s599_s3 + $0x38] sm:$0xff]  ;;  %p435_p0 = scmp.ne.s32.totalorder %s329_s24, %s434_s25  ;;  %p440_p2 = scmp.lt.s32.totalorder %s434_s25, %s434_s25 }
   0x8   :  { %379 = vmatprep.subr.mxu0 %v29_v4  ;;  %386 = vmatprep.subr.mxu1 %v190_v7  ;;  %v182_v15 = vld [vmem:[%s599_s3 + $0x30] sm:$0xff]  ;;  %v181_v16 = vld [vmem:[%s599_s3 + $0x28] sm:$0xff]  ;;  %v180_v17 = vld [vmem:[%s599_s3 + $0x20] sm:$0xff] }
   0x9   :  { %380 = vmatpush3.msra.mxu0 %v29_v4  ;;  %387 = vmatpush3.msra.mxu1 %v190_v7  ;;  %v179_v18 = vld [vmem:[%s599_s3 + $0x18] sm:$0xff]  ;;  %v178_v19 = vld [vmem:[%s599_s3 + $0x10] sm:$0xff]  ;;  %v177_v20 = vld [vmem:[%s599_s3 + $0x8] sm:$0xff]  ;;  %p441_p3 = por %p440_p2, %p439_p1 }
   0xa   :  { %382 = vmatmul.mubr.msk.f32.vlgmr.msra.gmra.mxu0 %vm40_vm0, %v521_v5  ;;  %388 = vmatprep.subr.mxu1 %v189_v8  ;;  %v176_v21 = vld [vmem:[%s599_s3] sm:$0xff] }
   0xb   :  { %389 = vmatpush3.msra.mxu1 %v189_v8  ;;  %v339_v22 = vld [vmem:[%s598_s2] ss:$0 sm:$0xff]  ;;  %p442_p4 = pnand %p441_p3, %p435_p0 }
   0xc   :  { %390 = vmatprep.subr.mxu1 %v188_v9 }
   0xd   :  { %391 = vmatpush3.msra.mxu1 %v188_v9 }
   0xe   :  { %392 = vmatprep.subr.mxu1 %v187_v10 }
   0xf   :  { %393 = vmatpush3.msra.mxu1 %v187_v10 }
  0x10   :  { %394 = vmatprep.subr.mxu1 %v186_v11 }
  0x11   :  { %395 = vmatpush3.msra.mxu1 %v186_v11 }
  0x12   :  { %396 = vmatprep.subr.mxu1 %v185_v12 }
  0x13   :  { %397 = vmatpush3.msra.mxu1 %v185_v12 }
  0x14   :  { %398 = vmatprep.subr.mxu1 %v184_v13 }
  0x15   :  { %399 = vmatpush3.msra.mxu1 %v184_v13 }
  0x16   :  { %400 = vmatprep.subr.mxu1 %v183_v14 }
  0x17   :  { %401 = vmatpush3.msra.mxu1 %v183_v14 }
  0x18   :  { %402 = vmatprep.subr.mxu1 %v182_v15 }
  0x19   :  { %403 = vmatpush3.msra.mxu1 %v182_v15 }
  0x1a   :  { %404 = vmatprep.subr.mxu1 %v181_v16 }
  0x1b   :  { %405 = vmatpush3.msra.mxu1 %v181_v16  ;;  %v346_v16 = vld [vmem:[%s600_s4] ss:$0 sm:$0xff] }
  0x1c   :  { %406 = vmatprep.subr.mxu1 %v180_v17 }
  0x1d   :  { %407 = vmatpush3.msra.mxu1 %v180_v17 }
  0x1e   :  { %408 = vmatprep.subr.mxu1 %v179_v18 }
  0x1f   :  { %409 = vmatpush3.msra.mxu1 %v179_v18 }
  0x20   :  { %410 = vmatprep.subr.mxu1 %v178_v19 }
  0x21   :  { %411 = vmatpush3.msra.mxu1 %v178_v19 }
  0x22   :  { %412 = vmatprep.subr.mxu1 %v177_v20 }
  0x23   :  { %413 = vmatpush3.msra.mxu1 %v177_v20 }
  0x24   :  { %414 = vmatprep.subr.mxu1 %v176_v21 }
  0x25   :  { %415 = vmatpush3.msra.mxu1 %v176_v21 }
  0xca   :  { %v383_v23 = vpop.f32.mrf.mxu0 }
  0xcb   :  { %v119_v24 = vadd.f32 %v383_v23, %v339_v22 }
  0xcc   :  { %v113_v25 = vpop.f32.mrf.mxu0 }
  0xcd   :  { %v125_v26 = vmul.f32 0.70710677, %v119_v24  ;;  %v114_v27 = vadd.f32 %v339_v22, %v113_v25  ;;  %v123_v12 = vmul.f32 0.5, %v119_v24 }
  0xcf   :  { %v127_v28 = vand.u32 2147483647, %v125_v26  ;;  %v124_v29 = vmul.f32 0.70710677, %v114_v27  ;;  %vm167_vm1 = vcmp.lt.f32.partialorder %v125_v26, 0.0  ;;  %v122_v10 = vmul.f32 0.5, %v114_v27 }
  0xd1   :  { %v129_v30 = vmul.f32 0.3275911, %v127_v28  ;;  %v126_v31 = vand.u32 2147483647, %v124_v29  ;;  %v155_v35 = vsub.f32 0.0, %v127_v28  ;;  %vm166_vm2 = vcmp.lt.f32.partialorder %v124_v29, 0.0 }
  0xd3   :  { %v131_v32 = vadd.f32 1.0, %v129_v30  ;;  %v128_v33 = vmul.f32 0.3275911, %v126_v31  ;;  %v154_v36 = vsub.f32 0.0, %v126_v31  ;;  %v157_v37 = vmul.f32 %v155_v35, %v127_v28 }
  0xd5   :  { %422 = vrcp.f32 %v131_v32  ;;  %v130_v34 = vadd.f32 1.0, %v128_v33  ;;  %v156_v39 = vmul.f32 %v154_v36, %v126_v31  ;;  %v160_v40 = vmul.f32 1.442695, %v157_v37 }
  0xd7   :  { %424 = vrcp.f32 %v130_v34  ;;  %v158_v44 = vmul.f32 1.442695, %v156_v39  ;;  %v347_v39 = vld [vmem:[%s601_s5] ss:$0 sm:$0xff] }
  0xd8   :  { %426 = vpow2.f32 %v160_v40 }
  0xd9   :  { %428 = vpow2.f32 %v158_v44 }
  0xe2   :  { %v423_v38 = vpop.eup %422 }
  0xe3   :  { %v137_v41 = vmul.f32 1.0614054, %v423_v38 }
  0xe4   :  { %v425_v42 = vpop.eup %424 }
  0xe5   :  { %v343_v43 = vadd.f32 -1.4531521, %v137_v41  ;;  %v136_v45 = vmul.f32 1.0614054, %v425_v42  ;;  %v427_v59 = vpop.eup %426  ;;  %v348_v41 = vld [vmem:[%s602_s6] ss:$0 sm:$0xff] }
  0xe6   :  { %v429_v63 = vpop.eup %428 }
  0xe7   :  { %v141_v46 = vmul.f32 %v423_v38, %v343_v43  ;;  %v342_v47 = vadd.f32 -1.4531521, %v136_v45 }
  0xe9   :  { %v143_v48 = vadd.f32 1.4214138, %v141_v46  ;;  %v140_v49 = vmul.f32 %v425_v42, %v342_v47 }
  0xeb   :  { %v145_v50 = vmul.f32 %v423_v38, %v143_v48  ;;  %v142_v51 = vadd.f32 1.4214138, %v140_v49 }
  0xed   :  { %v345_v52 = vadd.f32 -0.28449672, %v145_v50  ;;  %v144_v53 = vmul.f32 %v425_v42, %v142_v51 }
  0xef   :  { %v149_v54 = vmul.f32 %v423_v38, %v345_v52  ;;  %v344_v55 = vadd.f32 -0.28449672, %v144_v53 }
  0xf1   :  { %v151_v56 = vadd.f32 0.2548296, %v149_v54  ;;  %v148_v57 = vmul.f32 %v425_v42, %v344_v55 }
  0xf3   :  { %v153_v58 = vmul.f32 %v423_v38, %v151_v56  ;;  %v150_v60 = vadd.f32 0.2548296, %v148_v57 }
  0xf5   :  { %v163_v61 = vmul.f32 %v427_v59, %v153_v58  ;;  %v152_v62 = vmul.f32 %v425_v42, %v150_v60 }
  0xf7   :  { %v165_v0 = vsub.f32 1.0, %v163_v61  ;;  %v162_v1 = vmul.f32 %v429_v63, %v152_v62 }
  0xf9   :  { %v169_v3 = vsub.f32 0.0, %v165_v0  ;;  %v164_v4 = vsub.f32 1.0, %v162_v1 }
  0xfb   :  { %v171_v6 = vsel %vm167_vm1, %v169_v3, %v165_v0  ;;  %v168_v7 = vsub.f32 0.0, %v164_v4 }
  0xfc   :  { %v173_v9 = vadd.f32 1.0, %v171_v6 }
  0xfd   :  { %v170_v8 = vsel %vm166_vm2, %v168_v7, %v164_v4 }
  0xfe   :  { %v172_v11 = vadd.f32 1.0, %v170_v8  ;;  %v175_v14 = vmul.f32 %v173_v9, %v123_v12 }
 0x100   :  { %v174_v13 = vmul.f32 %v172_v11, %v122_v10 }
 0x102   :  { %416 = vmatprep.mubr.f32.mxu1 %v174_v13 }
 0x103   :  { %417 = vmatmul.mubr.f32.vlgmr.msra.gmra.mxu1 %v175_v14 }
 0x1c3   :  { %v418_v15 = vpop.f32.mrf.mxu1 }
 0x1c4   :  { %v271_v18 = vadd.f32 %v418_v15, %v346_v16 }
 0x1c5   :  { %v265_v17 = vpop.f32.mrf.mxu1 }
 0x1c6   :  { %v266_v19 = vadd.f32 %v346_v16, %v265_v17  ;;  %v275_v22 = vadd.f32 %v271_v18, %v521_v5 }
 0x1c8   :  { %v274_v20 = vadd.f32 %v266_v19, %v508_v2  ;;  %v281_v23 = vsel %vm40_vm0, %v275_v22, 0.0 }
 0x1ca   :  { %v278_v21 = vsel %vm40_vm0, %v274_v20, 0.0 }
 0x1cb   :  { %279 = vadd.xlane.f32.xlu0 %v278_v21 }
 0x1cf   :  { %282 = vadd.xlane.f32.xlu0 %v281_v23 }
 0x254   :  { %v280_v24 = vpop.xlane.xlu0 %279 }
 0x255   :  { %v285_v25 = vmul.f32 0.03125, %v280_v24 }
 0x257   :  { %v287_v26 = vsub.f32 %v274_v20, %v285_v25 }
 0x258   :  { %v283_v27 = vpop.xlane.xlu0 %282 }
 0x259   :  { %v286_v28 = vmul.f32 0.03125, %v283_v27  ;;  %v289_v29 = vmul.f32 %v287_v26, %v287_v26 }
 0x25b   :  { %v288_v30 = vsub.f32 %v275_v22, %v286_v28  ;;  %v291_v31 = vsel %vm40_vm0, %v289_v29, 0.0 }
 0x25c   :  { %292 = vadd.xlane.f32.xlu1 %v291_v31 }
 0x25d   :  { %v290_v32 = vmul.f32 %v288_v30, %v288_v30 }
 0x25f   :  { %v294_v2 = vsel %vm40_vm0, %v290_v32, 0.0 }
 0x260   :  { %295 = vadd.xlane.f32.xlu1 %v294_v2 }
 0x2e5   :  { %v293_v33 = vpop.xlane.xlu1 %292 }
 0x2e6   :  { %v297_v5 = vmul.f32 0.03125, %v293_v33 }
 0x2e8   :  { %v299_v34 = vadd.f32 1e-12, %v297_v5 }
 0x2e9   :  { %v296_v35 = vpop.xlane.xlu1 %295 }
 0x2ea   :  { %430 = vrsqrt.f32 %v299_v34  ;;  %v298_v36 = vmul.f32 0.03125, %v296_v35 }
 0x2ec   :  { %v300_v37 = vadd.f32 1e-12, %v298_v36 }
 0x2ee   :  { %432 = vrsqrt.f32 %v300_v37 }
 0x2f7   :  { %v431_v38 = vpop.eup %430 }
 0x2f8   :  { %v303_v40 = vmul.f32 %v431_v38, %v287_v26 }
 0x2fa   :  { %v311_v42 = vmul.f32 %v347_v39, %v303_v40 }
 0x2fb   :  { %v433_v43 = vpop.eup %432 }
 0x2fc   :  { %v304_v44 = vmul.f32 %v433_v43, %v288_v30  ;;  %v319_v45 = vadd.f32 %v348_v41, %v311_v42 }
 0x2fe   :  { %v312_v46 = vmul.f32 %v347_v39, %v304_v44  ;;  %321 = vst.msk [vmem:[#allocation2] sm:$0xff] %vm40_vm0, %v319_v45 }
 0x300   :  { %v320_v47 = vadd.f32 %v348_v41, %v312_v46 }
 0x302   :  { %322 = vst.msk [vmem:[#allocation2 + $0x8] sm:$0xff] %vm40_vm0, %v320_v47 }
 0x303   :  { %445 = shalt.err (!%p442_p4)
}
 0x304   :  { %s457_s5 = smov 128   ;;  %s458_s6 = smov 8  }
 0x305   :  { %334 = dma.vmem_to_hbm [thread:$0]  %s329_s24, 256, %s603_s7, [#allocation3], %s457_s5, %s457_s5, %s458_s6  }
 0x306   :  { %454 = dma.done.wait [#allocation3], 256  }
 0x307   :  { %455 = vsyncadd [#allocation3], 4294967040 }
 0x308   :  { %338 = vsyncpa [#allocation3], 1 }

</bundles_post_ra>
